<compile_context>
chip_gen: v7x
topology: tpu7x:2x2x1
jax: 0.10.0
libtpu: 0.0.40
codegen_flags: <defaults>
</compile_context>

<pallas_src>
import jax
import jax.numpy as jnp
from jax.experimental import pallas as pl
from jax.experimental.pallas import tpu as pltpu


def _fused_conv_block_kernel(p_ref, w1_ref, b1_ref, w2_ref, b2_ref, o_ref):
    """conv3x3(3->64)+ReLU then conv3x3(64->64)+ReLU for one (image, row strip).

    p_ref : (1, H+2, W2, 27) bf16  conv1 im2col of the whole padded image:
                                   row i <-> conv1 output row i-1,
                                   col j <-> conv1 output col j-1,
                                   last dim = (dy, dx, cin) taps folded.
    w1_ref: (27, 64)         bf16  conv1 weights, (dy, dx, cin) folded into K=27
    b1_ref: (1, 64)          f32
    w2_ref: (3, 192, 64)     bf16  conv2 weights, (dx, cin) folded into K=192
    b2_ref: (1, 64)          f32
    o_ref : (1, Sh, W, 64)   f32   output row strip
    """
    H = p_ref.shape[1] - 2
    W2 = p_ref.shape[2]
    Sh = o_ref.shape[1]           # output rows per strip
    W = o_ref.shape[2]
    Th = Sh + 2                   # conv1 rows needed by this strip (1-row halo)
    r0 = pl.multiple_of(pl.program_id(1) * Sh, Sh)   # first output row of strip

    # ---- conv1: 3 -> 64.  One K=27 MXU matmul (taps pre-folded in wrapper) --
    lhs1 = p_ref[0, pl.ds(r0, Th), :, :]                         # (Th, W2, 27)
    acc1 = jnp.dot(lhs1.reshape(Th * W2, 27), w1_ref[...],
                   preferred_element_type=jnp.float32)           # (Th*W2, 64)
    t = jnp.maximum(acc1.reshape(Th, W2, 64) + b1_ref[...], 0.0)

    # Zero the ring corresponding to conv2's zero padding (and the unused
    # alignment columns) so the fused conv2 sees the same zero-padded
    # intermediate the unfused reference would.
    yy = jax.lax.broadcasted_iota(jnp.int32, (Th, W2, 64), 0) + (r0 - 1)
    xx = jax.lax.broadcasted_iota(jnp.int32, (Th, W2, 64), 1) - 1
    inside = (yy >= 0) & (yy < H) & (xx >= 0) & (xx < W)
    t = jnp.where(inside, t, 0.0).astype(jnp.bfloat16)

    # ---- conv2: 64 -> 64.  dx+cin folded into K=192, 3 MXU matmuls over dy --
    acc2 = jnp.zeros((Sh * W, 64), jnp.float32)
    for dy in range(3):
        lhs2 = jnp.concatenate(
            [t[dy:dy + Sh, dx:dx + W, :] for dx in range(3)], axis=-1)
        acc2 = acc2 + jnp.dot(lhs2.reshape(Sh * W, 192), w2_ref[dy],
                              preferred_element_type=jnp.float32)
    out = jnp.maximum(acc2 + b2_ref[...], 0.0)
    o_ref[0] = out.reshape(Sh, W, 64).astype(o_ref.dtype)


def _pick_strip_height(H):
    """Largest 8-aligned strip that divides H and gives >= 2 strips per image."""
    for sh in (64, 32, 16, 8):
        if H % sh == 0 and H // sh >= 2:
            return sh
    return H


def fused_conv3x3x2_relu(x_nhwc, w1, b1, w2, b2):
    """Fused conv3x3(3->64)+ReLU -> conv3x3(64->64)+ReLU.  NHWC in / NHWC out."""
    N, H, W, cin = x_nhwc.shape
    assert cin == 3 and H % 8 == 0 and W % 8 == 0, (N, H, W, cin)
    Sh = _pick_strip_height(H)
    S = H // Sh
    W2 = W + 8                    # conv1 cols computed per row (>= W+2, 8-aligned)

    xb = x_nhwc.astype(jnp.bfloat16)
    # Zero-pad (2 top/bottom, 2 left, 8 right) then fold conv1's 3x3 taps into
    # the channel axis: patches[n, i, j, dy*9+dx*3+cin] = xpad[n, i+dy, j+dx, cin].
    # This wrapper-side im2col is layout plumbing; the MXU work stays in-kernel.
    xpad = jnp.pad(xb, ((0, 0), (2, 2), (2, W2 - W), (0, 0)))    # (N,H+4,W+10,3)
    patches = jnp.concatenate(
        [xpad[:, dy:dy + H + 2, dx:dx + W2, :]
         for dy in range(3) for dx in range(3)], axis=-1)        # (N,H+2,W2,27)

    w1r = w1.reshape(27, 64).astype(jnp.bfloat16)       # (dy*9+dx*3+cin, cout)
    w2r = w2.reshape(3, 192, 64).astype(jnp.bfloat16)   # (dy, dx*64+cin, cout)
    b1r = b1.reshape(1, 64).astype(jnp.float32)
    b2r = b2.reshape(1, 64).astype(jnp.float32)

    return pl.pallas_call(
        _fused_conv_block_kernel,
        out_shape=jax.ShapeDtypeStruct((N, H, W, 64), jnp.float32),
        grid_spec=pltpu.PrefetchScalarGridSpec(
            num_scalar_prefetch=0,
            grid=(N, S),
            in_specs=[
                # Whole per-image im2col slab; block index constant over the
                # strip axis -> DMA'd once per image, reused across strips.
                pl.BlockSpec((1, H + 2, W2, 27), lambda n, s: (n, 0, 0, 0)),
                pl.BlockSpec((27, 64), lambda n, s: (0, 0)),
                pl.BlockSpec((1, 64), lambda n, s: (0, 0)),
                pl.BlockSpec((3, 192, 64), lambda n, s: (0, 0, 0)),
                pl.BlockSpec((1, 64), lambda n, s: (0, 0)),
            ],
            out_specs=pl.BlockSpec((1, Sh, W, 64), lambda n, s: (n, s, 0, 0)),
        ),
        compiler_params=pltpu.CompilerParams(
            dimension_semantics=("parallel", "parallel"),
        ),
    )(patches, w1r, b1r, w2r, b2r)


def init_params(key):
    """Deterministic synthetic weights with the vgg19.features[0..3] shapes."""
    k0, k1, k2, k3 = jax.random.split(key, 4)
    # features[0]: Conv2d(3, 64, kernel_size=3, padding=1), HWIO layout.
    w0 = jax.random.normal(k0, (3, 3, 3, 64), jnp.float32) * 0.1
    b0 = jax.random.normal(k1, (64,), jnp.float32) * 0.01
    # features[2]: Conv2d(64, 64, kernel_size=3, padding=1), HWIO layout.
    w1 = jax.random.normal(k2, (3, 3, 64, 64), jnp.float32) * 0.05
    b1 = jax.random.normal(k3, (64,), jnp.float32) * 0.01
    return (w0, b0), (w1, b1)


@jax.jit
def vgg19_forward(x_nchw, params):
    """Mirrors VGG19.forward: returns [activation after features[3]] in NCHW."""
    (w1, b1), (w2, b2) = params
    x = jnp.transpose(x_nchw, (0, 2, 3, 1))           # NCHW -> NHWC
    y = fused_conv3x3x2_relu(x, w1, b1, w2, b2)       # features[0..3], fused
    return [jnp.transpose(y, (0, 3, 1, 2))]           # NHWC -> NCHW


def _reference_block(x_nchw, params):
    """Pure-JAX reference with the same bf16-operand / f32-acc quantization."""
    (w1, b1), (w2, b2) = params
    q = lambda a: a.astype(jnp.bfloat16).astype(jnp.float32)
    dn = ("NHWC", "HWIO", "NHWC")
    hp = jax.lax.Precision.HIGHEST
    x = q(jnp.transpose(x_nchw, (0, 2, 3, 1)))
    y = jax.lax.conv_general_dilated(x, q(w1), (1, 1), ((1, 1), (1, 1)),
                                     dimension_numbers=dn, precision=hp)
    y = q(jnp.maximum(y + b1, 0.0))
    y = jax.lax.conv_general_dilated(y, q(w2), (1, 1), ((1, 1), (1, 1)),
                                     dimension_numbers=dn, precision=hp)
    y = jnp.maximum(y + b2, 0.0)
    return jnp.transpose(y, (0, 3, 1, 2))


if __name__ == "__main__":
    key = jax.random.PRNGKey(0)
    k_x, k_p = jax.random.split(key)
    # Small NCHW input consistent with the module (VGG expects 3 input channels).
    x = jax.random.normal(k_x, (2, 3, 16, 16), jnp.float32)
    params = init_params(k_p)

    feature_maps = vgg19_forward(x, params)
    out = jax.block_until_ready(feature_maps[0])
    assert out.shape == (2, 64, 16, 16), out.shape

    ref = jax.block_until_ready(_reference_block(x, params))
    max_err = float(jnp.max(jnp.abs(out - ref)))
    assert max_err < 2e-2, f"max abs err vs reference: {max_err}"
    print("KERNEL_OK")
</pallas_src>

<mosaic_0001>
module attributes {stable_mosaic.version = 11 : i64} {
  func.func @_fused_conv_block_kernel(%arg0: i32, %arg1: i32, %arg2: memref<1x18x24x27xbf16, #tpu.memory_space<vmem>>, %arg3: memref<27x64xbf16, #tpu.memory_space<vmem>>, %arg4: memref<1x64xf32, #tpu.memory_space<vmem>>, %arg5: memref<3x192x64xbf16, #tpu.memory_space<vmem>>, %arg6: memref<1x64xf32, #tpu.memory_space<vmem>>, %arg7: memref<1x8x16x64xf32, #tpu.memory_space<vmem>>) attributes {dimension_semantics = [#tpu.dimension_semantics<parallel>, #tpu.dimension_semantics<parallel>], iteration_bounds = array<i64: 2, 2>, scalar_prefetch = 0 : i64, scratch_operands = 0 : i64, tpu.core_type = #tpu.core_type<tc>, window_params = [{transform_indices = @transform_0, window_bounds = array<i64: 1, 18, 24, 27>}, {pipeline_mode = #tpu.pipeline_mode<synchronous>, transform_indices = @transform_1, window_bounds = array<i64: 27, 64>}, {pipeline_mode = #tpu.pipeline_mode<synchronous>, transform_indices = @transform_2, window_bounds = array<i64: 1, 64>}, {pipeline_mode = #tpu.pipeline_mode<synchronous>, transform_indices = @transform_3, window_bounds = array<i64: 3, 192, 64>}, {pipeline_mode = #tpu.pipeline_mode<synchronous>, transform_indices = @transform_4, window_bounds = array<i64: 1, 64>}, {transform_indices = @transform_5, window_bounds = array<i64: 1, 8, 16, 64>}]} {
    %c8_i32 = arith.constant 8 : i32
    %0 = arith.muli %arg1, %c8_i32 : i32
    %1 = tpu.assume_multiple %0, 8 : i32
    %c0 = arith.constant 0 : index
    %2 = arith.index_cast %1 : i32 to index
    %c0_0 = arith.constant 0 : index
    %c0_1 = arith.constant 0 : index
    %3 = vector.load %arg2[%c0, %2, %c0_0, %c0_1] : memref<1x18x24x27xbf16, #tpu.memory_space<vmem>>, vector<1x10x24x27xbf16>
    %4 = vector.shape_cast %3 : vector<1x10x24x27xbf16> to vector<10x24x27xbf16>
    %5 = vector.shape_cast %4 : vector<10x24x27xbf16> to vector<240x27xbf16>
    %c0_2 = arith.constant 0 : index
    %c0_3 = arith.constant 0 : index
    %6 = vector.load %arg3[%c0_2, %c0_3] : memref<27x64xbf16, #tpu.memory_space<vmem>>, vector<27x64xbf16>
    %cst = arith.constant dense<0.000000e+00> : vector<240x64xf32>
    %7 = tpu.matmul %5, %6, %cst {dimension_numbers = #tpu.dot_dimension_numbers<[1], [0], [0], [1], [0, 0, 1, 1], [], []>} : vector<240x27xbf16>, vector<27x64xbf16>, vector<240x64xf32> -> vector<240x64xf32>
    %8 = vector.shape_cast %7 : vector<240x64xf32> to vector<10x24x64xf32>
    %c0_4 = arith.constant 0 : index
    %c0_5 = arith.constant 0 : index
    %9 = vector.load %arg4[%c0_4, %c0_5] : memref<1x64xf32, #tpu.memory_space<vmem>>, vector<1x64xf32>
    %10 = vector.shape_cast %9 : vector<1x64xf32> to vector<1x1x64xf32>
    %11 = vector.broadcast %10 : vector<1x1x64xf32> to vector<10x24x64xf32>
    %12 = arith.addf %8, %11 : vector<10x24x64xf32>
    %cst_6 = arith.constant 0.000000e+00 : f32
    %13 = vector.broadcast %cst_6 : f32 to vector<10x24x64xf32>
    %14 = arith.maximumf %12, %13 : vector<10x24x64xf32>
    %15 = tpu.iota {dimensions = array<i32: 0>} : vector<10x24x64xi32>
    %c1_i32 = arith.constant 1 : i32
    %16 = arith.subi %1, %c1_i32 : i32
    %17 = vector.broadcast %16 : i32 to vector<10x24x64xi32>
    %18 = arith.addi %15, %17 : vector<10x24x64xi32>
    %19 = tpu.iota {dimensions = array<i32: 1>} : vector<10x24x64xi32>
    %c1_i32_7 = arith.constant 1 : i32
    %20 = vector.broadcast %c1_i32_7 : i32 to vector<10x24x64xi32>
    %21 = arith.subi %19, %20 : vector<10x24x64xi32>
    %c0_i32 = arith.constant 0 : i32
    %22 = vector.broadcast %c0_i32 : i32 to vector<10x24x64xi32>
    %23 = arith.cmpi sge, %18, %22 : vector<10x24x64xi32>
    %c16_i32 = arith.constant 16 : i32
    %24 = vector.broadcast %c16_i32 : i32 to vector<10x24x64xi32>
    %25 = arith.cmpi slt, %18, %24 : vector<10x24x64xi32>
    %26 = arith.andi %23, %25 : vector<10x24x64xi1>
    %c0_i32_8 = arith.constant 0 : i32
    %27 = vector.broadcast %c0_i32_8 : i32 to vector<10x24x64xi32>
    %28 = arith.cmpi sge, %21, %27 : vector<10x24x64xi32>
    %29 = arith.andi %26, %28 : vector<10x24x64xi1>
    %c16_i32_9 = arith.constant 16 : i32
    %30 = vector.broadcast %c16_i32_9 : i32 to vector<10x24x64xi32>
    %31 = arith.cmpi slt, %21, %30 : vector<10x24x64xi32>
    %32 = arith.andi %29, %31 : vector<10x24x64xi1>
    %cst_10 = arith.constant 0.000000e+00 : f32
    %33 = vector.broadcast %cst_10 : f32 to vector<10x24x64xf32>
    %34 = arith.select %32, %14, %33 : vector<10x24x64xi1>, vector<10x24x64xf32>
    %35 = arith.truncf %34 : vector<10x24x64xf32> to vector<10x24x64xbf16>
    %cst_11 = arith.constant 0.000000e+00 : f32
    %36 = vector.broadcast %cst_11 : f32 to vector<128x64xf32>
    %37 = vector.extract_strided_slice %35 {offsets = [0, 0, 0], sizes = [8, 16, 64], strides = [1, 1, 1]} : vector<10x24x64xbf16> to vector<8x16x64xbf16>
    %38 = vector.extract_strided_slice %35 {offsets = [0, 1, 0], sizes = [8, 16, 64], strides = [1, 1, 1]} : vector<10x24x64xbf16> to vector<8x16x64xbf16>
    %39 = vector.extract_strided_slice %35 {offsets = [0, 2, 0], sizes = [8, 16, 64], strides = [1, 1, 1]} : vector<10x24x64xbf16> to vector<8x16x64xbf16>
    %40 = tpu.concatenate %37, %38, %39 in 2 : vector<8x16x64xbf16>, vector<8x16x64xbf16>, vector<8x16x64xbf16> -> vector<8x16x192xbf16>
    %41 = vector.shape_cast %40 : vector<8x16x192xbf16> to vector<128x192xbf16>
    %c0_12 = arith.constant 0 : index
    %c0_13 = arith.constant 0 : index
    %c0_14 = arith.constant 0 : index
    %42 = vector.load %arg5[%c0_12, %c0_13, %c0_14] : memref<3x192x64xbf16, #tpu.memory_space<vmem>>, vector<1x192x64xbf16>
    %43 = vector.shape_cast %42 : vector<1x192x64xbf16> to vector<192x64xbf16>
    %cst_15 = arith.constant dense<0.000000e+00> : vector<128x64xf32>
    %44 = tpu.matmul %41, %43, %cst_15 {dimension_numbers = #tpu.dot_dimension_numbers<[1], [0], [0], [1], [0, 0, 1, 1], [], []>} : vector<128x192xbf16>, vector<192x64xbf16>, vector<128x64xf32> -> vector<128x64xf32>
    %45 = arith.addf %36, %44 : vector<128x64xf32>
    %46 = vector.extract_strided_slice %35 {offsets = [1, 0, 0], sizes = [8, 16, 64], strides = [1, 1, 1]} : vector<10x24x64xbf16> to vector<8x16x64xbf16>
    %47 = vector.extract_strided_slice %35 {offsets = [1, 1, 0], sizes = [8, 16, 64], strides = [1, 1, 1]} : vector<10x24x64xbf16> to vector<8x16x64xbf16>
    %48 = vector.extract_strided_slice %35 {offsets = [1, 2, 0], sizes = [8, 16, 64], strides = [1, 1, 1]} : vector<10x24x64xbf16> to vector<8x16x64xbf16>
    %49 = tpu.concatenate %46, %47, %48 in 2 : vector<8x16x64xbf16>, vector<8x16x64xbf16>, vector<8x16x64xbf16> -> vector<8x16x192xbf16>
    %50 = vector.shape_cast %49 : vector<8x16x192xbf16> to vector<128x192xbf16>
    %c1 = arith.constant 1 : index
    %c0_16 = arith.constant 0 : index
    %c0_17 = arith.constant 0 : index
    %51 = vector.load %arg5[%c1, %c0_16, %c0_17] : memref<3x192x64xbf16, #tpu.memory_space<vmem>>, vector<1x192x64xbf16>
    %52 = vector.shape_cast %51 : vector<1x192x64xbf16> to vector<192x64xbf16>
    %cst_18 = arith.constant dense<0.000000e+00> : vector<128x64xf32>
    %53 = tpu.matmul %50, %52, %cst_18 {dimension_numbers = #tpu.dot_dimension_numbers<[1], [0], [0], [1], [0, 0, 1, 1], [], []>} : vector<128x192xbf16>, vector<192x64xbf16>, vector<128x64xf32> -> vector<128x64xf32>
    %54 = arith.addf %45, %53 : vector<128x64xf32>
    %55 = vector.extract_strided_slice %35 {offsets = [2, 0, 0], sizes = [8, 16, 64], strides = [1, 1, 1]} : vector<10x24x64xbf16> to vector<8x16x64xbf16>
    %56 = vector.extract_strided_slice %35 {offsets = [2, 1, 0], sizes = [8, 16, 64], strides = [1, 1, 1]} : vector<10x24x64xbf16> to vector<8x16x64xbf16>
    %57 = vector.extract_strided_slice %35 {offsets = [2, 2, 0], sizes = [8, 16, 64], strides = [1, 1, 1]} : vector<10x24x64xbf16> to vector<8x16x64xbf16>
    %58 = tpu.concatenate %55, %56, %57 in 2 : vector<8x16x64xbf16>, vector<8x16x64xbf16>, vector<8x16x64xbf16> -> vector<8x16x192xbf16>
    %59 = vector.shape_cast %58 : vector<8x16x192xbf16> to vector<128x192xbf16>
    %c2 = arith.constant 2 : index
    %c0_19 = arith.constant 0 : index
    %c0_20 = arith.constant 0 : index
    %60 = vector.load %arg5[%c2, %c0_19, %c0_20] : memref<3x192x64xbf16, #tpu.memory_space<vmem>>, vector<1x192x64xbf16>
    %61 = vector.shape_cast %60 : vector<1x192x64xbf16> to vector<192x64xbf16>
    %cst_21 = arith.constant dense<0.000000e+00> : vector<128x64xf32>
    %62 = tpu.matmul %59, %61, %cst_21 {dimension_numbers = #tpu.dot_dimension_numbers<[1], [0], [0], [1], [0, 0, 1, 1], [], []>} : vector<128x192xbf16>, vector<192x64xbf16>, vector<128x64xf32> -> vector<128x64xf32>
    %63 = arith.addf %54, %62 : vector<128x64xf32>
    %c0_22 = arith.constant 0 : index
    %c0_23 = arith.constant 0 : index
    %64 = vector.load %arg6[%c0_22, %c0_23] : memref<1x64xf32, #tpu.memory_space<vmem>>, vector<1x64xf32>
    %65 = vector.broadcast %64 : vector<1x64xf32> to vector<128x64xf32>
    %66 = arith.addf %63, %65 : vector<128x64xf32>
    %cst_24 = arith.constant 0.000000e+00 : f32
    %67 = vector.broadcast %cst_24 : f32 to vector<128x64xf32>
    %68 = arith.maximumf %66, %67 : vector<128x64xf32>
    %69 = vector.shape_cast %68 : vector<128x64xf32> to vector<8x16x64xf32>
    %c0_25 = arith.constant 0 : index
    %c0_26 = arith.constant 0 : index
    %c0_27 = arith.constant 0 : index
    %c0_28 = arith.constant 0 : index
    %70 = vector.load %arg7[%c0_25, %c0_26, %c0_27, %c0_28] : memref<1x8x16x64xf32, #tpu.memory_space<vmem>>, vector<1x8x16x64xf32>
    %71 = vector.shape_cast %70 : vector<1x8x16x64xf32> to vector<8x16x64xf32>
    %72 = vector.shape_cast %69 : vector<8x16x64xf32> to vector<1x8x16x64xf32>
    tpu.vector_store %arg7[%c0_25, %c0_26, %c0_27, %c0_28], %72 {strides = array<i32>} : memref<1x8x16x64xf32, #tpu.memory_space<vmem>>, vector<1x8x16x64xf32>,
    return
  }
  func.func @transform_0(%arg0: i32, %arg1: i32) -> (i32, i32, i32, i32) {
    %c0_i32 = arith.constant 0 : i32
    %c0_i32_0 = arith.constant 0 : i32
    %c0_i32_1 = arith.constant 0 : i32
    %c0_i32_2 = arith.constant 0 : i32
    return %arg0, %c0_i32, %c0_i32_0, %c0_i32_1 : i32, i32, i32, i32
  }
  func.func @transform_1(%arg0: i32, %arg1: i32) -> (i32, i32) {
    %c0_i32 = arith.constant 0 : i32
    %c0_i32_0 = arith.constant 0 : i32
    %c0_i32_1 = arith.constant 0 : i32
    return %c0_i32, %c0_i32_0 : i32, i32
  }
  func.func @transform_2(%arg0: i32, %arg1: i32) -> (i32, i32) {
    %c0_i32 = arith.constant 0 : i32
    %c0_i32_0 = arith.constant 0 : i32
    %c0_i32_1 = arith.constant 0 : i32
    return %c0_i32, %c0_i32_0 : i32, i32
  }
  func.func @transform_3(%arg0: i32, %arg1: i32) -> (i32, i32, i32) {
    %c0_i32 = arith.constant 0 : i32
    %c0_i32_0 = arith.constant 0 : i32
    %c0_i32_1 = arith.constant 0 : i32
    %c0_i32_2 = arith.constant 0 : i32
    return %c0_i32, %c0_i32_0, %c0_i32_1 : i32, i32, i32
  }
  func.func @transform_4(%arg0: i32, %arg1: i32) -> (i32, i32) {
    %c0_i32 = arith.constant 0 : i32
    %c0_i32_0 = arith.constant 0 : i32
    %c0_i32_1 = arith.constant 0 : i32
    return %c0_i32, %c0_i32_0 : i32, i32
  }
  func.func @transform_5(%arg0: i32, %arg1: i32) -> (i32, i32, i32, i32) {
    %c0_i32 = arith.constant 0 : i32
    %c0_i32_0 = arith.constant 0 : i32
    %c0_i32_1 = arith.constant 0 : i32
    return %arg0, %arg1, %c0_i32, %c0_i32_0 : i32, i32, i32, i32
  }
}

</mosaic_0001>

<bundles_post_ra>
// kernel: vgg19_forward.1
= control target key start
LH: loop header
LB: loop body
LE: loop exit
PB: predicated region body
PF: predicated region fallthrough
CT: control target
= control target key end

     0   :  { %10 = vsyncpa [#allocation3], 0  ;;  %s3280_s0 = inlined_call_operand.vmem [shape: bf16[2,18,24,27], index: 0, kind: input, shape index: {}]   ;;  %s3281_s1 = inlined_call_operand.vmem [shape: bf16[27,64], index: 1, kind: input, shape index: {}]   ;;  %s3282_s2 = inlined_call_operand.vmem [shape: f32[1,64], index: 2, kind: input, shape index: {}]   ;;  %s3283_s3 = inlined_call_operand.vmem [shape: bf16[3,192,64], index: 3, kind: input, shape index: {}]   ;;  %s3284_s4 = inlined_call_operand.vmem [shape: f32[1,64], index: 4, kind: input, shape index: {}]   ;;  %s3285_s5 = inlined_call_operand.hbm [shape: f32[2,16,16,64], index: 5, kind: output, shape index: {}]  }
   0x1   :  { %12 = vsyncpa [#allocation3 + $0x1], 0  ;;  %s2336_s18 = smov 0   ;;  %s2338_s19 = smov 0  }
   0x2   :  { %s2340_s20 = smov 0   ;;  %s2342_s21 = smov 0  }
   0x3   :  { %s2344_s22 = smov 0   ;;  %s2346_s23 = smov 0  }
   0x4   :  { %s2348_s24 = smov 0   ;;  %s2350_s25 = smov 0  }
   0x5 LB: > { %s1800_s26 = sadd.s32 4294967295, %s2296_s25   ;;  %s1801_s27 = sadd.s32 4294967294, %s2296_s25   ;;  %s2296_s25 = sphi %s2350_s25, %s18_s25   ;;  %s2292_s24 = sphi %s2348_s24, %s3314_s24   ;;  %s2288_s23 = sphi %s2346_s23, %s3313_s23   ;;  %s2284_s22 = sphi %s2344_s22, %s3312_s22   ;;  %s2280_s21 = sphi %s2342_s21, %s3311_s21   ;;  %s2276_s20 = sphi %s2340_s20, %s3310_s20   ;;  %s2272_s19 = sphi %s2338_s19, %s3309_s19   ;;  %s2268_s18 = sphi %s2336_s18, %s3308_s18  }
   0x6   : > { %s27_s28 = sadd.s32 1, %s2288_s23  ;;  %s30_s29 = sadd.s32 1, %s2292_s24 }
   0x7   : > { %p28_p0 = scmp.ge.s32.totalorder %s27_s28, 2  ;;  %p159_p1 = scmp.ne.s32.totalorder %s2276_s20, %s2272_s19 }
   0x8   : > { %p160_p2 = scmp.eq.s32.totalorder %s1800_s26, 3  ;;  %p165_p5 = scmp.ne.s32.totalorder %s2272_s19, %s2268_s18 }
   0x9   : > { %s3316_s28 = smov (%p28_p0, %s27_s28), 0  ;;  %s3318_s29 = smov (!%p28_p0, %s30_s29), %s2292_s24 }
   0xa   : > { %s145_s30 = ssub.s32 %s2288_s23, %s3316_s28  ;;  %p2387_p3 = por %p160_p2, %p159_p1 }
   0xb   : > { %p32_p4 = scmp.ge.s32.totalorder %s3318_s29, 2  ;;  %p166_p6 = scmp.eq.s32.totalorder %s1801_s27, 3 }
   0xc   : > { %p1804_p7 = scmp.ge.s32.totalorder %s2296_s25, 1  ;;  %p204_p9 = scmp.lt.s32.totalorder %s2296_s25, 5 }
   0xd   : > { %s3320_s29 = smov (%p32_p4, %s3318_s29), 0  ;;  %p2396_p8 = por %p166_p6, %p165_p5 }
   0xe   : > { %s144_s8 = ssub.s32 %s2292_s24, %s3320_s29  ;;  %s149_s9 = sadd.s32 1, %s2276_s20 }
   0xf   : > { %s146_s10 = sor.u32 %s145_s30, %s144_s8  ;;  %p205_p10 = pnand %p1804_p7, %p204_p9 }
  0x10   : > { %p147_p11 = scmp.eq.s32.totalorder %s146_s10, 0  ;;  %v2149_v0 = vld [vmem:[%s3281_s1] sm:$0xff] (!%p205_p10)   ;;  %v2298_v1 = vmov (!%p205_p10), 0.0   ;;  %v2150_v2 = vld [vmem:[%s3281_s1 + $0x8] sm:$0x3f] (!%p205_p10)   ;;  %vm409_vm0 = vcmask (!%p205_p10), 1044480   ;;  %v647_v30 = vlaneseq (!%p205_p10) }
  0x11   : > { %208 = sbr.rel (%p205_p10) target bundleno = 782 (0x30e), region = 40  ;;  %1982 = vmatprep.subr.bf16.mxu0 (!%p205_p10), %v2298_v1  ;;  %vm410_vm1 = vcmask (!%p205_p10), 1045504   ;;  %p232_p12 = scmp.lt.s32.totalorder (!%p205_p10), %s2284_s22, 1  ;;  %v2299_v3 = vmov (!%p205_p10), 65535   ;;  %vm2300_vm2 = vmmov (!%p205_p10), 0   ;;  %vm363_vm3 = vcmask (!%p205_p10), 220160  }
  0x12   : > { %s2405_s11 = scalar_select %p147_p11, %s2276_s20, %s149_s9  }
  0x13   : > { %1983 = vmatpush3.bf16.msra.mxu0 (!%p205_p10), %v2149_v0  ;;  %v411_v4 = vsel (!%p205_p10), %vm409_vm0, 4294967295, %v2299_v3  ;;  %1986 = vmatprep.mubr.msk.bf16.mxu0 (!%p205_p10), %vm2300_vm2, %v2298_v1  ;;  %s1963_s16 = smul.u32 (!%p205_p10), 96, %s2280_s21  ;;  %v2166_v22 = vld [vmem:[%s3283_s3 + $0x60] sm:$0xff] (!%p205_p10)   ;;  %v2301_v23 = vmov (!%p205_p10), 0   ;;  %v2167_v24 = vld [vmem:[%s3283_s3 + $0x68] sm:$0xff] (!%p205_p10)   ;;  %v2168_v25 = vld [vmem:[%s3283_s3 + $0x70] sm:$0xff] (!%p205_p10)  }
  0x14   : > { %1984 = vmatprep.subr.bf16.mxu0 (!%p205_p10), %v2298_v1  ;;  %v412_v5 = vsel (!%p205_p10), %vm410_vm1, %v411_v4, 0  ;;  %1146 = vmatprep.subr.bf16.mxu1 (!%p205_p10), %v2301_v23  ;;  %v2169_v26 = vld [vmem:[%s3283_s3 + $0x78] sm:$0xff] (!%p205_p10)   ;;  %v2486_v27 = vld [vmem:[%s3283_s3 + $0xc0] sm:$0xff] (!%p205_p10)   ;;  %v2497_v29 = vld [vmem:[%s3283_s3 + $0xc8] sm:$0xff] (!%p205_p10)   ;;  %s1807_s13 = sshll.u32 (!%p205_p10), %s2280_s21, 3  ;;  %v648_v33 = vshrl.u32 (!%p205_p10), %v647_v30, 7 }
  0x15   : > { %v414_v6 = vand.u32 (!%p205_p10), %v2150_v2, %v412_v5  ;;  %1147 = vmatpush1.bf16.msra.mxu1 (!%p205_p10), %v2166_v22  ;;  %v2171_v28 = vld [vmem:[%s3283_s3 + $0x80] sm:$0xff] (!%p205_p10)   ;;  %v2173_v31 = vld [vmem:[%s3283_s3 + $0x88] sm:$0xff] (!%p205_p10)   ;;  %v2509_v32 = vld [vmem:[%s3283_s3 + $0xd0] sm:$0xff] (!%p205_p10)   ;;  %s2302_s15 = smov (!%p205_p10), 64  }
  0x16   : > { %1148 = vmatprep.subr.bf16.mxu1 (!%p205_p10), %v2301_v23  ;;  %v2175_v34 = vld [vmem:[%s3283_s3 + $0x90] sm:$0xff] (!%p205_p10)   ;;  %v2522_v36 = vld [vmem:[%s3283_s3 + $0xd8] sm:$0xff] (!%p205_p10)   ;;  %v2524_v37 = vadd.s32 (!%p205_p10), 4294967295, %v648_v33  ;;  %v2530_v38 = vld [vmem:[%s3282_s2] ss:$0 sm:$0xff] (!%p205_p10)  ;;  %v650_v63 = vadd.s32 (!%p205_p10), 16, %v648_v33 }
  0x17   : > { %1985 = vmatpush3.bf16.msra.mxu0 (!%p205_p10), %v414_v6  ;;  %v2177_v39 = vld [vmem:[%s3283_s3 + $0x98] sm:$0xff] (!%p205_p10)   ;;  %v2542_v40 = vld [vmem:[%s3283_s3 + $0xe0] sm:$0xff] (!%p205_p10)   ;;  %v2558_v47 = vld [vmem:[%s3283_s3 + $0xe8] sm:$0xff] (!%p205_p10)  }
  0x18   : > { %s233_s17 = scalar_select %p232_p12, %s2284_s22, 1  ;;  %1537 = vmatprep.subr.bf16.mxu0 %v2301_v23  ;;  %v2179_v42 = vld [vmem:[%s3283_s3 + $0xa0] sm:$0xff]   ;;  %vm684_vm7 = vcmp.ge.s32.totalorder %v2524_v37, 0  ;;  %v2181_v51 = vld [vmem:[%s3283_s3 + $0xa8] sm:$0xff]   ;;  %v2574_v53 = vld [vmem:[%s3283_s3 + $0xf0] sm:$0xff]   ;;  %v2601_v3 = vadd.s32 4294967295, %v650_v63 }
  0x19   : > { %1149 = vmatpush1.bf16.msra.mxu1 %v2167_v24  ;;  %v2183_v59 = vld [vmem:[%s3283_s3 + $0xb0] sm:$0xff]   ;;  %v2592_v62 = vld [vmem:[%s3283_s3 + $0xf8] sm:$0xff]   ;;  %v2611_v6 = vld [vmem:[%s3283_s3 + $0x100] sm:$0xff]  }
  0x1a   : > { %s2070_s26 = smul.u32 216, %s233_s17  ;;  %1150 = vmatprep.subr.bf16.mxu1 %v2301_v23  ;;  %vm719_vm13 = vcmp.lt.s32.totalorder %v2601_v3, 16 }
  0x1c   : > { %s236_s8 = scalar_lea.vmem %s3280_s0, %s2070_s26  ;;  %s2303_s26 = smov [#allocation2]  }
  0x1d   : > { %s2420_s9 = scalar_lea.vmem %s236_s8, %s1963_s16  ;;  %1151 = vmatpush1.bf16.msra.mxu1 %v2168_v25  ;;  %s1843_s16 = sadd.s32 4294967295, %s1807_s13 }
  0x1e   : > { %v2151_v7 = vld [vmem:[%s2420_s9] sm:$0xff]   ;;  %v2152_v8 = vld [vmem:[%s2420_s9 + $0x8] sm:$0xff]   ;;  %v2153_v9 = vld [vmem:[%s2420_s9 + $0x10] sm:$0xff]   ;;  %1152 = vmatprep.subr.bf16.mxu1 %v2301_v23  ;;  %v2516_v35 = vstv %s1843_s16  ;;  %s229_s16 = sand.u32 1, %s2272_s19   ;;  %s1964_s8 = sshll.u32 %s2280_s21, 4 }
  0x1f   : > { %1987 = vmatmul.mubr.msk.bf16.vlgmr.msra.gmra.mrb[0].mxu0 %vm363_vm3, %v2151_v7  ;;  %v2154_v10 = vld [vmem:[%s2420_s9 + $0x18] sm:$0xff]   ;;  %v2155_v11 = vld [vmem:[%s2420_s9 + $0x20] sm:$0xff]   ;;  %v2156_v12 = vld [vmem:[%s2420_s9 + $0x28] sm:$0xff]   ;;  %vm654_vm4 = vcmp.ge.s32.totalorder %v2516_v35, 0  ;;  %vm664_vm5 = vcmp.lt.s32.totalorder %v2516_v35, 16  ;;  %v638_v58 = vadd.s32 1, %v2516_v35 }
  0x20   : > { %1990 = vmatprep.mubr.msk.bf16.mxu0 %vm2300_vm2, %v2298_v1  ;;  %v2157_v13 = vld [vmem:[%s2420_s9 + $0x30] sm:$0xff]   ;;  %v2158_v14 = vld [vmem:[%s2420_s9 + $0x38] sm:$0xff]   ;;  %v2159_v15 = vld [vmem:[%s2420_s9 + $0x40] sm:$0xff]   ;;  %1538 = vmatpush1.bf16.msra.mxu0 %v2486_v27  ;;  %v645_v44 = vadd.s32 8, %v2516_v35  ;;  %s1805_s27 = sshll.u32 %s229_s16, 7 }
  0x21   : > { %v2160_v16 = vld [vmem:[%s2420_s9 + $0x48] sm:$0xff]   ;;  %v2161_v17 = vld [vmem:[%s2420_s9 + $0x50] sm:$0xff]   ;;  %v2162_v18 = vld [vmem:[%s2420_s9 + $0x58] sm:$0xff]   ;;  %1153 = vmatpush1.bf16.msra.mxu1 %v2169_v26  ;;  %1539 = vmatprep.subr.bf16.mxu0 %v2301_v23  ;;  %vm655_vm9 = vcmp.ge.s32.totalorder %v638_v58, 0  ;;  %vm665_vm10 = vcmp.lt.s32.totalorder %v638_v58, 16  ;;  %s3142_s30 = scalar_lea.vmem [#allocation2], %s1805_s27 }
  0x22   : > { %v2163_v19 = vld [vmem:[%s2420_s9 + $0x60] sm:$0xff]   ;;  %v2164_v20 = vld [vmem:[%s2420_s9 + $0x68] sm:$0xff]   ;;  %v2165_v21 = vld [vmem:[%s2420_s9 + $0x70] sm:$0xff]   ;;  %1154 = vmatprep.subr.bf16.mxu1 %v2301_v23  ;;  %s1959_s9 = sshll.u32 %s2284_s22, 5  ;;  %s1722_s13 = sshll.u32 %s3142_s30, 4  ;;  %s3220_s13 = int_to_ptr.vmem [resolvable:$true] %s1722_s13 }
  0x23   : > { %vm2548_vm6 = vmand %vm654_vm4, %vm664_vm5  ;;  %vm800_vm5 = vsmask.f32 7424  ;;  %s1719_s10 = sadd.s32 %s1964_s8, %s1959_s9  ;;  %s2202_s17 = scalar_lea.vmem %s3220_s13, 2048 }
  0x24   : > { %1540 = vmatpush1.bf16.msra.mxu0 %v2497_v29  ;;  %vm687_vm8 = vmand %vm2548_vm6, %vm684_vm7  ;;  %s1960_s12 = sshll.u32 %s1719_s10, 7  ;;  %p2203_p13 = scmp.ne.s32.totalorder %s3220_s13, %s2202_s17 }
  0x25   : > { %1155 = vmatpush1.bf16.msra.mxu1 %v2171_v28  ;;  %1541 = vmatprep.subr.bf16.mxu0 %v2301_v23  ;;  %vm2603_vm11 = vmand %vm655_vm9, %vm665_vm10  ;;  %s3218_s22 = scalar_lea.hbm %s3285_s5, %s1960_s12  ;;  %s2206_s27 = sshll.u32 %s2303_s26, 4  ;;  %s2207_s27 = int_to_ptr.vmem [resolvable:$false] %s2206_s27 }
  0x26   : > { %1156 = vmatprep.subr.bf16.mxu1 %v2301_v23  ;;  %vm690_vm12 = vmand %vm2603_vm11, %vm684_vm7  ;;  %p2204_p0 = pnand %p2203_p13, %p2387_p3  ;;  %s2208_s8 = scalar_lea.vmem %s2207_s27, 4096 }
  0x27   : > { %1991 = vmatmul.mubr.msk.bf16.gmra.mrb[4].mxu0 %vm363_vm3, %v2152_v8  ;;  %vm725_vm14 = vmand %vm2603_vm11, %vm719_vm13  ;;  %p2209_p2 = scmp.lt.s32.totalorder %s3220_s13, %s2207_s27  ;;  %p2210_p4 = scmp.lt.s32.totalorder %s2208_s8, %s2202_s17 }
  0x28   : > { %1994 = vmatprep.mubr.msk.bf16.mxu0 %vm2300_vm2, %v2298_v1  ;;  %1542 = vmatpush1.bf16.msra.mxu0 %v2509_v32  ;;  %p2205_p1 = pneg %p2204_p0 }
  0x29   : > { %1157 = vmatpush1.bf16.msra.mxu1 %v2173_v31  ;;  %1543 = vmatprep.subr.bf16.mxu0 %v2301_v23  ;;  %p2211_p5 = por %p2210_p4, %p2209_p2 }
  0x2a   : > { %1158 = vmatprep.subr.bf16.mxu1 %v2301_v23 }
  0x2b   : > { %p2212_p6 = pnand %p2211_p5, %p2205_p1 }
  0x2c   : > { %1544 = vmatpush1.bf16.msra.mxu0 %v2522_v36 }
  0x2d   : > { %1159 = vmatpush1.bf16.msra.mxu1 %v2175_v34  ;;  %1545 = vmatprep.subr.bf16.mxu0 %v2301_v23 }
  0x2e   : > { %1160 = vmatprep.subr.bf16.mxu1 %v2301_v23 }
  0x2f   : > { %1995 = vmatmul.mubr.msk.bf16.gmra.mrb[8].mxu0 %vm363_vm3, %v2153_v9 }
  0x30   : > { %1998 = vmatprep.mubr.msk.bf16.mxu0 %vm2300_vm2, %v2298_v1  ;;  %1546 = vmatpush1.bf16.msra.mxu0 %v2542_v40 }
  0x31   : > { %1161 = vmatpush1.bf16.msra.mxu1 %v2177_v39  ;;  %1547 = vmatprep.subr.bf16.mxu0 %v2301_v23 }
  0x32   : > { %1162 = vmatprep.subr.bf16.mxu1 %v2301_v23 }
  0x34   : > { %1548 = vmatpush1.bf16.msra.mxu0 %v2558_v47 }
  0x35   : > { %1163 = vmatpush1.bf16.msra.mxu1 %v2179_v42  ;;  %1549 = vmatprep.subr.bf16.mxu0 %v2301_v23 }
  0x36   : > { %1164 = vmatprep.subr.bf16.mxu1 %v2301_v23 }
  0x37   : > { %1999 = vmatmul.mubr.msk.bf16.gmra.mrb[12].mxu0 %vm363_vm3, %v2154_v10 }
  0x38   : > { %2002 = vmatprep.mubr.msk.bf16.mxu0 %vm2300_vm2, %v2298_v1  ;;  %1550 = vmatpush1.bf16.msra.mxu0 %v2574_v53 }
  0x39   : > { %1165 = vmatpush1.bf16.msra.mxu1 %v2181_v51  ;;  %1551 = vmatprep.subr.bf16.mxu0 %v2301_v23 }
  0x3a   : > { %1166 = vmatprep.subr.bf16.mxu1 %v2301_v23 }
  0x3c   : > { %1552 = vmatpush1.bf16.msra.mxu0 %v2592_v62 }
  0x3d   : > { %1167 = vmatpush1.bf16.msra.mxu1 %v2183_v59  ;;  %1553 = vmatprep.subr.bf16.mxu0 %v2301_v23 }
  0x3e   : > { %1168 = vmatprep.subr.bf16.mxu1 %v2301_v23 }
  0x3f   : > { %2003 = vmatmul.mubr.msk.bf16.gmra.mrb[16].mxu0 %vm363_vm3, %v2155_v11  ;;  %v639_v11 = vadd.s32 2, %v2516_v35 }
  0x40   : > { %2006 = vmatprep.mubr.msk.bf16.mxu0 %vm2300_vm2, %v2298_v1  ;;  %1554 = vmatpush1.bf16.msra.mxu0 %v2611_v6 }
  0x41   : > { %1555 = vmatprep.subr.bf16.mxu0 %v2301_v23  ;;  %vm656_vm15 = vcmp.ge.s32.totalorder %v639_v11, 0  ;;  %vm666_vm0 = vcmp.lt.s32.totalorder %v639_v11, 16 }
  0x42   : > { %vm2646_vm1 = vmand %vm656_vm15, %vm666_vm0 }
  0x43   : > { %vm693_vm4 = vmand %vm2646_vm1, %vm684_vm7 }
  0x47   : > { %2007 = vmatmul.mubr.msk.bf16.gmra.mrb[20].mxu0 %vm363_vm3, %v2156_v12 }
  0x48   : > { %2010 = vmatprep.mubr.msk.bf16.mxu0 %vm2300_vm2, %v2298_v1 }
  0x4f   : > { %2011 = vmatmul.mubr.msk.bf16.gmra.mrb[24].mxu0 %vm363_vm3, %v2157_v13 }
  0x50   : > { %2014 = vmatprep.mubr.msk.bf16.mxu0 %vm2300_vm2, %v2298_v1 }
  0x57   : > { %2015 = vmatmul.mubr.msk.bf16.gmra.mrb[28].mxu0 %vm363_vm3, %v2158_v14 }
  0x58   : > { %2018 = vmatprep.mubr.msk.bf16.mxu0 %vm2300_vm2, %v2298_v1 }
  0x5f   : > { %2019 = vmatmul.mubr.msk.bf16.gmra.mrb[32].mxu0 %vm363_vm3, %v2159_v15  ;;  %v2631_v15 = vld [vmem:[%s3283_s3 + $0x108] sm:$0xff]  }
  0x60   : > { %2022 = vmatprep.mubr.msk.bf16.mxu0 %vm2300_vm2, %v2298_v1  ;;  %1556 = vmatpush1.bf16.msra.mxu0 %v2631_v15 }
  0x61   : > { %1557 = vmatprep.subr.bf16.mxu0 %v2301_v23 }
  0x67   : > { %2023 = vmatmul.mubr.msk.bf16.gmra.mrb[36].mxu0 %vm363_vm3, %v2160_v16 }
  0x68   : > { %2026 = vmatprep.mubr.msk.bf16.mxu0 %vm2300_vm2, %v2298_v1 }
  0x6f   : > { %2027 = vmatmul.mubr.msk.bf16.gmra.mrb[40].mxu0 %vm363_vm3, %v2161_v17 }
  0x70   : > { %2030 = vmatprep.mubr.msk.bf16.mxu0 %vm2300_vm2, %v2298_v1 }
  0x77   : > { %2031 = vmatmul.mubr.msk.bf16.gmra.mrb[44].mxu0 %vm363_vm3, %v2162_v18 }
  0x78   : > { %2034 = vmatprep.mubr.msk.bf16.mxu0 %vm2300_vm2, %v2298_v1 }
  0x7f   : > { %2035 = vmatmul.mubr.msk.bf16.gmra.mrb[48].mxu0 %vm363_vm3, %v2163_v19 }
  0x80   : > { %2038 = vmatprep.mubr.msk.bf16.mxu0 %vm2300_vm2, %v2298_v1 }
  0x87   : > { %2039 = vmatmul.mubr.msk.bf16.gmra.mrb[52].mxu0 %vm363_vm3, %v2164_v20  ;;  %v2641_v20 = vld [vmem:[%s3283_s3 + $0x110] sm:$0xff]  }
  0x88   : > { %2042 = vmatprep.mubr.msk.bf16.mxu0 %vm2300_vm2, %v2298_v1  ;;  %v2185_v1 = vld [vmem:[%s3283_s3 + $0xb8] sm:$0xff]   ;;  %vm954_vm2 = vcmask 523264   ;;  %1558 = vmatpush1.bf16.msra.mxu0 %v2641_v20 }
  0x89   : > { %1169 = vmatpush1.bf16.msra.mxu1 %v2185_v1  ;;  %1559 = vmatprep.subr.bf16.mxu0 %v2301_v23 }
  0x8a   : > { %1318 = vmatprep.subr.bf16.mxu1 %v2301_v23 }
  0x8f   : > { %2043 = vmatmul.mubr.msk.bf16.gmra.mrb[56].mxu0 %vm363_vm3, %v2165_v21  ;;  %vm929_vm3 = vcmask 1046528  }
  0xf2   : > { %v450_v41 = vpop.f32.mrb[0].mxu0 }
  0xf3   : > { %v576_v43 = vadd.f32 %v2530_v38, %v450_v41  ;;  %v1988_v45 = vpop.f32.mrb[1].mxu0 }
  0xf4   : > { %v453_v46 = vpop.f32.mrb[2].mxu0 }
  0xf5   : > { %v606_v48 = vmax.f32 %v576_v43, 0.0  ;;  %v577_v49 = vadd.f32 %v2530_v38, %v453_v46  ;;  %v1989_v50 = vpop.f32.mrb[3].mxu0  ;;  %v2656_v43 = vld [vmem:[%s3283_s3 + $0x118] sm:$0xff]  }
  0xf6   : > { %1560 = vmatpush1.bf16.msra.mxu0 %v2656_v43 }
  0xf7   : > { %v607_v52 = vmax.f32 %v577_v49, 0.0  ;;  %v750_v54 = vsel %vm687_vm8, %v606_v48, 0.0  ;;  %vm728_vm8 = vmand %vm2646_vm1, %vm719_vm13 }
  0xf9   : > { %v751_v55 = vsel %vm2548_vm6, %v607_v52, 0.0 }
  0xfa   : > { %v2579_v56 = vpack.c.bf16 %v751_v55, %v750_v54  ;;  %v2581_v57 = vpop.f32.mrb[4].mxu0 }
  0xfb   : > { %v1992_v60 = vpop.f32.mrb[5].mxu0 }
  0xfc   : > { %v461_v61 = vpop.f32.mrb[6].mxu0 }
  0xfd   : > { %v1993_v0 = vpop.f32.mrb[7].mxu0  ;;  %v579_v2 = vadd.f32 %v2530_v38, %v461_v61  ;;  %v640_v61 = vadd.s32 3, %v2516_v35 }
  0xff   : > { %v609_v7 = vmax.f32 %v579_v2, 0.0  ;;  %vm657_vm9 = vcmp.ge.s32.totalorder %v640_v61, 0  ;;  %vm667_vm10 = vcmp.lt.s32.totalorder %v640_v61, 16 }
 0x101   : > { %v753_v16 = vsel %vm690_vm12, %v609_v7, 0.0 }
 0x102   : > { %v466_v5 = vpop.f32.mrb[8].mxu0 }
 0x103   : > { %v580_v8 = vadd.f32 %v2530_v38, %v466_v5  ;;  %v1996_v9 = vpop.f32.mrb[9].mxu0 }
 0x104   : > { %v469_v10 = vpop.f32.mrb[10].mxu0 }
 0x105   : > { %v610_v12 = vmax.f32 %v580_v8, 0.0  ;;  %v581_v13 = vadd.f32 %v2530_v38, %v469_v10  ;;  %v1997_v14 = vpop.f32.mrb[11].mxu0 }
 0x107   : > { %v754_v17 = vsel %vm2603_vm11, %v610_v12, 0.0  ;;  %v611_v18 = vmax.f32 %v581_v13, 0.0  ;;  %vm2684_vm11 = vmand %vm657_vm9, %vm667_vm10 }
 0x108   : > { %v2635_v19 = vpack.c.bf16 %v754_v17, %v753_v16  ;;  %vm696_vm12 = vmand %vm2684_vm11, %vm684_vm7 }
 0x109   : > { %v755_v21 = vsel %vm725_vm14, %v611_v18, 0.0  ;;  %vm731_vm14 = vmand %vm2684_vm11, %vm719_vm13 }
 0x10a   : > { %v783_v22 = vpack.c.bf16 %v755_v21, %v755_v21  ;;  %v474_v24 = vpop.f32.mrb[12].mxu0  ;;  %v816_v25 = vshll.u32 %v2635_v19, 16  ;;  %v933_v31 = vrot.slane %v2635_v19, 1  ;;  %v814_v41 = vshrl.u32 %v2635_v19, 16 }
 0x10b   : > { %v582_v26 = vadd.f32 %v2530_v38, %v474_v24  ;;  %v2000_v30 = vpop.f32.mrb[13].mxu0 }
 0x10c   : > { %v821_v33 = vshll.u32 %v783_v22, 16  ;;  %v477_v34 = vpop.f32.mrb[14].mxu0  ;;  %v934_v39 = vrot.slane %v783_v22, 1  ;;  %v818_v42 = vrot.slane %v816_v25, 1  ;;  %v641_v30 = vadd.s32 4, %v2516_v35 }
 0x10d   : > { %v612_v45 = vmax.f32 %v582_v26, 0.0  ;;  %v583_v46 = vadd.f32 %v2530_v38, %v477_v34  ;;  %v2001_v48 = vpop.f32.mrb[15].mxu0 }
 0x10e   : > { %v2665_v49 = vsel %vm929_vm3, %v933_v31, %v934_v39  ;;  %v819_v50 = vor.u32 %v818_v42, %v814_v41  ;;  %v823_v51 = vrot.slane %v821_v33, 1  ;;  %vm658_vm15 = vcmp.ge.s32.totalorder %v641_v30, 0 }
 0x10f   : > { %v613_v52 = vmax.f32 %v583_v46, 0.0  ;;  %1883 = vmatprep.mubr.msk.bf16.mxu1 %vm954_vm2, %v2665_v49  ;;  %v756_v55 = vsel %vm693_vm4, %v612_v45, 0.0  ;;  %vm668_vm0 = vcmp.lt.s32.totalorder %v641_v30, 16 }
 0x110   : > { %v824_v54 = vsel %vm800_vm5, %v819_v50, %v823_v51 }
 0x111   : > { %v757_v58 = vsel %vm2646_vm1, %v613_v52, 0.0  ;;  %899 = vrot.lane.b32.xlu0 %v824_v54, %s2302_s15  ;;  %vm2716_vm1 = vmand %vm658_vm15, %vm668_vm0 }
 0x112   : > { %v2674_v59 = vpack.c.bf16 %v757_v58, %v756_v55  ;;  %v482_v60 = vpop.f32.mrb[16].mxu0  ;;  %vm699_vm4 = vmand %vm2716_vm1, %vm684_vm7  ;;  %v643_v55 = vadd.s32 6, %v2516_v35 }
 0x113   : > { %v584_v63 = vadd.f32 %v2530_v38, %v482_v60  ;;  %v2004_v0 = vpop.f32.mrb[17].mxu0 }
 0x114   : > { %v485_v1 = vpop.f32.mrb[18].mxu0  ;;  %v828_v2 = vshll.u32 %v2674_v59, 16  ;;  %v936_v16 = vrot.slane %v2674_v59, 1  ;;  %v826_v17 = vshrl.u32 %v2674_v59, 16  ;;  %vm660_vm15 = vcmp.ge.s32.totalorder %v643_v55, 0 }
 0x115   : > { %v614_v4 = vmax.f32 %v584_v63, 0.0  ;;  %v2005_v5 = vpop.f32.mrb[19].mxu0  ;;  %v585_v8 = vadd.f32 %v2530_v38, %v485_v1  ;;  %vm670_vm0 = vcmp.lt.s32.totalorder %v643_v55, 16  ;;  %v578_v55 = vadd.f32 %v2530_v38, %v2581_v57 }
 0x116   : > { %v830_v10 = vrot.slane %v828_v2, 1 }
 0x117   : > { %v758_v7 = vsel %vm728_vm8, %v614_v4, 0.0  ;;  %v615_v18 = vmax.f32 %v585_v8, 0.0  ;;  %vm734_vm8 = vmand %vm2716_vm1, %vm719_vm13 }
 0x118   : > { %v785_v9 = vpack.c.bf16 %v758_v7, %v758_v7  ;;  %v831_v28 = vor.u32 %v830_v10, %v826_v17 }
 0x119   : > { %v759_v41 = vsel %vm696_vm12, %v615_v18, 0.0 }
 0x11a   : > { %v833_v12 = vshll.u32 %v785_v9, 16  ;;  %v937_v13 = vrot.slane %v785_v9, 1  ;;  %v490_v14 = vpop.f32.mrb[20].mxu0 }
 0x11b   : > { %v586_v21 = vadd.f32 %v2530_v38, %v490_v14  ;;  %v2008_v22 = vpop.f32.mrb[21].mxu0  ;;  %v642_v14 = vadd.s32 5, %v2516_v35 }
 0x11c   : > { %v835_v24 = vrot.slane %v833_v12, 1  ;;  %v493_v25 = vpop.f32.mrb[22].mxu0  ;;  %v2696_v26 = vsel %vm929_vm3, %v936_v16, %v937_v13 }
 0x11d   : > { %v616_v31 = vmax.f32 %v586_v21, 0.0  ;;  %v587_v33 = vadd.f32 %v2530_v38, %v493_v25  ;;  %v2009_v34 = vpop.f32.mrb[23].mxu0  ;;  %1947 = vmatprep.mubr.msk.bf16.mxu0 %vm954_vm2, %v2696_v26  ;;  %vm659_vm9 = vcmp.ge.s32.totalorder %v642_v14, 0  ;;  %vm669_vm10 = vcmp.lt.s32.totalorder %v642_v14, 16 }
 0x11e   : > { %v836_v39 = vsel %vm800_vm5, %v831_v28, %v835_v24 }
 0x11f   : > { %v760_v42 = vsel %vm2684_vm11, %v616_v31, 0.0  ;;  %v617_v45 = vmax.f32 %v587_v33, 0.0  ;;  %901 = vrot.lane.b32.xlu0 %v836_v39, %s2302_s15  ;;  %vm2743_vm11 = vmand %vm659_vm9, %vm669_vm10 }
 0x120   : > { %v2710_v46 = vpack.c.bf16 %v760_v42, %v759_v41  ;;  %vm702_vm12 = vmand %vm2743_vm11, %vm684_vm7 }
 0x121   : > { %v761_v48 = vsel %vm731_vm14, %v617_v45, 0.0  ;;  %vm737_vm14 = vmand %vm2743_vm11, %vm719_vm13 }
 0x122   : > { %v2712_v50 = vpack.c.bf16 %v761_v48, %v761_v48  ;;  %v498_v51 = vpop.f32.mrb[24].mxu0  ;;  %v840_v52 = vshll.u32 %v2710_v46, 16  ;;  %v838_v63 = vshrl.u32 %v2710_v46, 16 }
 0x123   : > { %v588_v54 = vadd.f32 %v2530_v38, %v498_v51  ;;  %v2012_v58 = vpop.f32.mrb[25].mxu0 }
 0x124   : > { %v845_v60 = vshll.u32 %v2712_v50, 16  ;;  %v501_v61 = vpop.f32.mrb[26].mxu0  ;;  %v842_v0 = vrot.slane %v840_v52, 1 }
 0x125   : > { %v618_v1 = vmax.f32 %v588_v54, 0.0  ;;  %v589_v2 = vadd.f32 %v2530_v38, %v501_v61  ;;  %v2013_v4 = vpop.f32.mrb[27].mxu0 }
 0x126   : > { %v843_v5 = vor.u32 %v842_v0, %v838_v63  ;;  %v847_v7 = vrot.slane %v845_v60, 1 }
 0x127   : > { %v619_v8 = vmax.f32 %v589_v2, 0.0  ;;  %v762_v10 = vsel %vm699_vm4, %v618_v1, 0.0 }
 0x128   : > { %v848_v9 = vsel %vm800_vm5, %v843_v5, %v847_v7 }
 0x129   : > { %v763_v11 = vsel %vm2716_vm1, %v619_v8, 0.0  ;;  %903 = vrot.lane.b32.xlu1 %v848_v9, %s2302_s15  ;;  %vm2770_vm1 = vmand %vm660_vm15, %vm670_vm0  ;;  %vm662_vm15 = vcmp.ge.s32.totalorder %v645_v44, 0  ;;  %vm672_vm0 = vcmp.lt.s32.totalorder %v645_v44, 16 }
 0x12a   : > { %v2731_v12 = vpack.c.bf16 %v763_v11, %v762_v10  ;;  %v506_v13 = vpop.f32.mrb[28].mxu0  ;;  %vm705_vm4 = vmand %vm2770_vm1, %vm684_vm7 }
 0x12b   : > { %v590_v16 = vadd.f32 %v2530_v38, %v506_v13  ;;  %v2016_v17 = vpop.f32.mrb[29].mxu0 }
 0x12c   : > { %v509_v18 = vpop.f32.mrb[30].mxu0  ;;  %v852_v21 = vshll.u32 %v2731_v12, 16  ;;  %v850_v41 = vshrl.u32 %v2731_v12, 16 }
 0x12d   : > { %v620_v22 = vmax.f32 %v590_v16, 0.0  ;;  %v2017_v24 = vpop.f32.mrb[31].mxu0  ;;  %v591_v28 = vadd.f32 %v2530_v38, %v509_v18 }
 0x12e   : > { %v854_v31 = vrot.slane %v852_v21, 1 }
 0x12f   : > { %v764_v25 = vsel %vm734_vm8, %v620_v22, 0.0  ;;  %v621_v42 = vmax.f32 %v591_v28, 0.0  ;;  %vm740_vm8 = vmand %vm2770_vm1, %vm719_vm13 }
 0x130   : > { %v2741_v30 = vpack.c.bf16 %v764_v25, %v764_v25  ;;  %v855_v54 = vor.u32 %v854_v31, %v850_v41 }
 0x131   : > { %v765_v0 = vsel %vm702_vm12, %v621_v42, 0.0  ;;  %vm722_vm12 = vmand %vm2548_vm6, %vm719_vm13 }
 0x132   : > { %v857_v34 = vshll.u32 %v2741_v30, 16  ;;  %v514_v39 = vpop.f32.mrb[32].mxu0 }
 0x133   : > { %v592_v45 = vadd.f32 %v2530_v38, %v514_v39  ;;  %v2020_v48 = vpop.f32.mrb[33].mxu0 }
 0x134   : > { %v859_v51 = vrot.slane %v857_v34, 1  ;;  %v517_v52 = vpop.f32.mrb[34].mxu0 }
 0x135   : > { %v622_v58 = vmax.f32 %v592_v45, 0.0  ;;  %v593_v60 = vadd.f32 %v2530_v38, %v517_v52  ;;  %v2021_v61 = vpop.f32.mrb[35].mxu0  ;;  %v644_v45 = vadd.s32 7, %v2516_v35 }
 0x136   : > { %v860_v63 = vsel %vm800_vm5, %v855_v54, %v859_v51 }
 0x137   : > { %v766_v1 = vsel %vm2743_vm11, %v622_v58, 0.0  ;;  %v623_v2 = vmax.f32 %v593_v60, 0.0  ;;  %905 = vrot.lane.b32.xlu1 %v860_v63, %s2302_s15  ;;  %vm661_vm9 = vcmp.ge.s32.totalorder %v644_v45, 0  ;;  %vm671_vm10 = vcmp.lt.s32.totalorder %v644_v45, 16 }
 0x138   : > { %v2764_v4 = vpack.c.bf16 %v766_v1, %v765_v0  ;;  %vm2799_vm11 = vmand %vm661_vm9, %vm671_vm10 }
 0x139   : > { %v767_v5 = vsel %vm737_vm14, %v623_v2, 0.0  ;;  %v608_v2 = vmax.f32 %v578_v55, 0.0  ;;  %vm708_vm14 = vmand %vm2799_vm11, %vm684_vm7 }
 0x13a   : > { %v2766_v7 = vpack.c.bf16 %v767_v5, %v767_v5  ;;  %v522_v8 = vpop.f32.mrb[36].mxu0  ;;  %v864_v9 = vshll.u32 %v2764_v4, 16  ;;  %v862_v17 = vshrl.u32 %v2764_v4, 16  ;;  %vm743_vm6 = vmand %vm2799_vm11, %vm719_vm13 }
 0x13b   : > { %v594_v10 = vadd.f32 %v2530_v38, %v522_v8  ;;  %v2024_v13 = vpop.f32.mrb[37].mxu0 }
 0x13c   : > { %v869_v14 = vshll.u32 %v2766_v7, 16  ;;  %v525_v16 = vpop.f32.mrb[38].mxu0  ;;  %v866_v18 = vrot.slane %v864_v9, 1 }
 0x13d   : > { %v624_v21 = vmax.f32 %v594_v10, 0.0  ;;  %v595_v22 = vadd.f32 %v2530_v38, %v525_v16  ;;  %v2025_v24 = vpop.f32.mrb[39].mxu0 }
 0x13e   : > { %v871_v25 = vrot.slane %v869_v14, 1  ;;  %v867_v28 = vor.u32 %v866_v18, %v862_v17  ;;  %v752_v18 = vsel %vm722_vm12, %v608_v2, 0.0 }
 0x13f   : > { %v625_v31 = vmax.f32 %v595_v22, 0.0  ;;  %v768_v34 = vsel %vm705_vm4, %v624_v21, 0.0 }
 0x140   : > { %v872_v33 = vsel %vm800_vm5, %v867_v28, %v871_v25 }
 0x141   : > { %v769_v39 = vsel %vm2770_vm1, %v625_v31, 0.0  ;;  %907 = vrot.lane.b32.xlu0 %v872_v33, %s2302_s15  ;;  %vm2833_vm1 = vmand %vm662_vm15, %vm672_vm0 }
 0x142   : > { %v2785_v41 = vpack.c.bf16 %v769_v39, %v768_v34  ;;  %v530_v42 = vpop.f32.mrb[40].mxu0  ;;  %v2824_v34 = vpack.c.bf16 %v752_v18, %v752_v18  ;;  %vm711_vm4 = vmand %vm2833_vm1, %vm684_vm7 }
 0x143   : > { %v596_v48 = vadd.f32 %v2530_v38, %v530_v42  ;;  %v2028_v51 = vpop.f32.mrb[41].mxu0 }
 0x144   : > { %v533_v52 = vpop.f32.mrb[42].mxu0  ;;  %v876_v54 = vshll.u32 %v2785_v41, 16  ;;  %v874_v9 = vshrl.u32 %v2785_v41, 16 }
 0x145   : > { %v626_v58 = vmax.f32 %v596_v48, 0.0  ;;  %v2029_v60 = vpop.f32.mrb[43].mxu0  ;;  %v597_v63 = vadd.f32 %v2530_v38, %v533_v52  ;;  %v804_v52 = vshll.u32 %v2579_v56, 16 }
 0x146   : > { %v878_v1 = vrot.slane %v876_v54, 1  ;;  %v809_v60 = vshll.u32 %v2824_v34, 16 }
 0x147   : > { %v770_v61 = vsel %vm740_vm8, %v626_v58, 0.0  ;;  %v627_v10 = vmax.f32 %v597_v63, 0.0  ;;  %vm746_vm8 = vmand %vm2833_vm1, %vm719_vm13 }
 0x148   : > { %v2797_v0 = vpack.c.bf16 %v770_v61, %v770_v61  ;;  %v879_v17 = vor.u32 %v878_v1, %v874_v9 }
 0x149   : > { %v771_v28 = vsel %vm708_vm14, %v627_v10, 0.0 }
 0x14a   : > { %v881_v57 = vshll.u32 %v2797_v0, 16  ;;  %v538_v8 = vpop.f32.mrb[44].mxu0 }
 0x14b   : > { %v598_v11 = vadd.f32 %v2530_v38, %v538_v8  ;;  %v2032_v13 = vpop.f32.mrb[45].mxu0 }
 0x14c   : > { %v883_v14 = vrot.slane %v881_v57, 1  ;;  %v541_v16 = vpop.f32.mrb[46].mxu0 }
 0x14d   : > { %v628_v21 = vmax.f32 %v598_v11, 0.0  ;;  %v599_v22 = vadd.f32 %v2530_v38, %v541_v16  ;;  %v2033_v24 = vpop.f32.mrb[47].mxu0  ;;  %v806_v11 = vrot.slane %v804_v52, 1 }
 0x14e   : > { %v884_v25 = vsel %vm800_vm5, %v879_v17, %v883_v14  ;;  %v811_v14 = vrot.slane %v809_v60, 1  ;;  %v802_v17 = vshrl.u32 %v2579_v56, 16  ;;  %v646_v24 = vadd.s32 9, %v2516_v35 }
 0x14f   : > { %v772_v31 = vsel %vm2799_vm11, %v628_v21, 0.0  ;;  %v629_v33 = vmax.f32 %v599_v22, 0.0  ;;  %909 = vrot.lane.b32.xlu1 %v884_v25, %s2302_s15 }
 0x150   : > { %v2826_v39 = vpack.c.bf16 %v772_v31, %v771_v28  ;;  %v807_v25 = vor.u32 %v806_v11, %v802_v17  ;;  %vm663_vm9 = vcmp.ge.s32.totalorder %v646_v24, 0  ;;  %vm673_vm10 = vcmp.lt.s32.totalorder %v646_v24, 16 }
 0x151   : > { %v773_v42 = vsel %vm743_vm6, %v629_v33, 0.0  ;;  %vm2864_vm11 = vmand %vm663_vm9, %vm673_vm10 }
 0x152   : > { %v2828_v45 = vpack.c.bf16 %v773_v42, %v773_v42  ;;  %v546_v48 = vpop.f32.mrb[48].mxu0  ;;  %v888_v51 = vshll.u32 %v2826_v39, 16  ;;  %v886_v1 = vshrl.u32 %v2826_v39, 16  ;;  %v812_v42 = vsel %vm800_vm5, %v807_v25, %v811_v14  ;;  %vm714_vm12 = vmand %vm2864_vm11, %vm684_vm7 }
 0x153   : > { %v600_v54 = vadd.f32 %v2530_v38, %v546_v48  ;;  %v2036_v58 = vpop.f32.mrb[49].mxu0  ;;  %vm749_vm14 = vmand %vm2864_vm11, %vm719_vm13 }
 0x154   : > { %v893_v61 = vshll.u32 %v2828_v45, 16  ;;  %v549_v63 = vpop.f32.mrb[50].mxu0  ;;  %v890_v2 = vrot.slane %v888_v51, 1 }
 0x155   : > { %v630_v5 = vmax.f32 %v600_v54, 0.0  ;;  %v601_v57 = vadd.f32 %v2530_v38, %v549_v63  ;;  %v2037_v8 = vpop.f32.mrb[51].mxu0 }
 0x156   : > { %v895_v9 = vrot.slane %v893_v61, 1  ;;  %v891_v10 = vor.u32 %v890_v2, %v886_v1 }
 0x157   : > { %v631_v13 = vmax.f32 %v601_v57, 0.0  ;;  %v774_v44 = vsel %vm711_vm4, %v630_v5, 0.0 }
 0x158   : > { %v896_v16 = vsel %vm800_vm5, %v891_v10, %v895_v9 }
 0x159   : > { %v775_v18 = vsel %vm2833_vm1, %v631_v13, 0.0  ;;  %911 = vrot.lane.b32.xlu0 %v896_v16, %s2302_s15 }
 0x15a   : > { %v2850_v21 = vpack.c.bf16 %v775_v18, %v774_v44  ;;  %v554_v22 = vpop.f32.mrb[52].mxu0 }
 0x15b   : > { %v602_v28 = vadd.f32 %v2530_v38, %v554_v22  ;;  %v2040_v31 = vpop.f32.mrb[53].mxu0 }
 0x15c   : > { %v557_v33 = vpop.f32.mrb[54].mxu0  ;;  %v1006_v48 = vshll.u32 %v2850_v21, 16  ;;  %v1004_v1 = vshrl.u32 %v2850_v21, 16 }
 0x15d   : > { %v632_v51 = vmax.f32 %v602_v28, 0.0  ;;  %897 = vrot.lane.b32.xlu0 %v812_v42, %s2302_s15  ;;  %v2041_v52 = vpop.f32.mrb[55].mxu0  ;;  %v603_v54 = vadd.f32 %v2530_v38, %v557_v33 }
 0x15e   : > { %v1008_v60 = vrot.slane %v1006_v48, 1  ;;  %v2190_v48 = vld [vmem:[%s3283_s3] sm:$0xff]  }
 0x15f   : > { %v776_v35 = vsel %vm746_vm8, %v632_v51, 0.0  ;;  %v633_v2 = vmax.f32 %v603_v54, 0.0  ;;  %v2192_v54 = vld [vmem:[%s3283_s3 + $0x10] sm:$0xff]  }
 0x160   : > { %v2862_v58 = vpack.c.bf16 %v776_v35, %v776_v35  ;;  %v1009_v10 = vor.u32 %v1008_v60, %v1004_v1  ;;  %v2191_v35 = vld [vmem:[%s3283_s3 + $0x8] sm:$0xff]   ;;  %v940_v60 = vrot.slane %v2712_v50, 1  ;;  %v2194_v1 = vld [vmem:[%s3283_s3 + $0x20] sm:$0xff]  }
 0x161   : > { %v777_v17 = vsel %vm714_vm12, %v633_v2, 0.0  ;;  %v943_v2 = vrot.slane %v2741_v30, 1 }
 0x162   : > { %v1011_v61 = vshll.u32 %v2862_v58, 16  ;;  %v562_v63 = vpop.f32.mrb[56].mxu0 }
 0x163   : > { %v604_v5 = vadd.f32 %v2530_v38, %v562_v63  ;;  %v2044_v57 = vpop.f32.mrb[57].mxu0 }
 0x164   : > { %v1013_v8 = vrot.slane %v1011_v61, 1  ;;  %v565_v9 = vpop.f32.mrb[58].mxu0  ;;  %v939_v61 = vrot.slane %v2710_v46, 1  ;;  %v942_v57 = vrot.slane %v2731_v12, 1 }
 0x165   : > { %v634_v11 = vmax.f32 %v604_v5, 0.0  ;;  %v605_v13 = vadd.f32 %v2530_v38, %v565_v9  ;;  %v2045_v14 = vpop.f32.mrb[59].mxu0 }
 0x166   : > { %v1014_v16 = vsel %vm800_vm5, %v1009_v10, %v1013_v8  ;;  %v2927_v50 = vsel %vm929_vm3, %v939_v61, %v940_v60  ;;  %v2196_v8 = vld [vmem:[%s3283_s3 + $0x30] sm:$0xff]   ;;  %v2951_v30 = vsel %vm929_vm3, %v942_v57, %v943_v2  ;;  %v2197_v10 = vld [vmem:[%s3283_s3 + $0x38] sm:$0xff]   ;;  %v945_v14 = vrot.slane %v2764_v4, 1 }
 0x167   : > { %v778_v37 = vsel %vm2864_vm11, %v634_v11, 0.0  ;;  %v635_v44 = vmax.f32 %v605_v13, 0.0  ;;  %1015 = vrot.lane.b32.xlu1 %v1014_v16, %s2302_s15  ;;  %v946_v11 = vrot.slane %v2766_v7, 1  ;;  %v2199_v16 = vld [vmem:[%s3283_s3 + $0x48] sm:$0xff]  }
 0x168   : > { %v2884_v18 = vpack.c.bf16 %v778_v37, %v777_v17  ;;  %v2200_v37 = vld [vmem:[%s3283_s3 + $0x50] sm:$0xff]  }
 0x169   : > { %v779_v22 = vsel %vm749_vm14, %v635_v44, 0.0  ;;  %v2978_v7 = vsel %vm929_vm3, %v945_v14, %v946_v11 }
 0x16a   : > { %v2886_v24 = vpack.c.bf16 %v779_v22, %v779_v22  ;;  %v1418_v38 = vshll.u32 %v2884_v18, 16  ;;  %v1416_v25 = vshrl.u32 %v2884_v18, 16  ;;  %v948_v22 = vrot.slane %v2785_v41, 1 }
 0x16c   : > { %v1423_v3 = vshll.u32 %v2886_v24, 16  ;;  %v1420_v28 = vrot.slane %v1418_v38, 1  ;;  %v2201_v38 = vld [vmem:[%s3283_s3 + $0x58] sm:$0xff]  }
 0x16e   : > { %v1425_v31 = vrot.slane %v1423_v3, 1  ;;  %v1421_v33 = vor.u32 %v1420_v28, %v1416_v25  ;;  %v952_v25 = vrot.slane %v2828_v45, 1  ;;  %v951_v28 = vrot.slane %v2826_v39, 1 }
 0x170   : > { %v1426_v42 = vsel %vm800_vm5, %v1421_v33, %v1425_v31  ;;  %v953_v33 = vsel %vm929_vm3, %v951_v28, %v952_v25 }
 0x171   : > { %1427 = vrot.lane.b32.xlu1 %v1426_v42, %s2302_s15  ;;  %v1020_v42 = vrot.slane %v2862_v58, 1  ;;  %s3228_s15 = scalar_lea.sflag [#allocation3], %s229_s16 }
 0x183   : > { %v900_v51 = vpop.permute.xlu0 %899 }
 0x184   : > { %v2898_v52 = vsel %vm954_vm2, %v2635_v19, %v900_v51  ;;  %v2193_v19 = vld [vmem:[%s3283_s3 + $0x18] sm:$0xff]   ;;  %v1019_v51 = vrot.slane %v2850_v21, 1 }
 0x185   : > { %1179 = vmatmul.mubr.bf16.vlgmr.msra.gmra.mrb[0].mxu1 %v2898_v52 }
 0x186   : > { %1884 = vmatprep.mubr.msk.bf16.mxu1 %vm954_vm2, %v2696_v26  ;;  %1319 = vmatpush1.bf16.msra.mxu1 %v2190_v48 }
 0x187   : > { %1320 = vmatprep.subr.bf16.mxu1 %v2301_v23 }
 0x18a   : > { %1321 = vmatpush1.bf16.msra.mxu1 %v2191_v35  ;;  %v931_v35 = vrot.slane %v2824_v34, 1 }
 0x18b   : > { %1322 = vmatprep.subr.bf16.mxu1 %v2301_v23 }
 0x18e   : > { %1323 = vmatpush1.bf16.msra.mxu1 %v2192_v54 }
 0x18f   : > { %1324 = vmatprep.subr.bf16.mxu1 %v2301_v23 }
 0x191   : > { %v902_v55 = vpop.permute.xlu0 %901 }
 0x192   : > { %v2919_v63 = vsel %vm954_vm2, %v2674_v59, %v902_v55  ;;  %1325 = vmatpush1.bf16.msra.mxu1 %v2193_v19  ;;  %v2195_v59 = vld [vmem:[%s3283_s3 + $0x28] sm:$0xff]   ;;  %v930_v19 = vrot.slane %v2579_v56, 1 }
 0x193   : > { %1187 = vmatmul.mubr.bf16.gmra.mrb[4].mxu1 %v2919_v63  ;;  %1570 = vmatmul.mubr.bf16.vlgmr.msra.gmra.mrb[60].mxu0 %v2919_v63 }
 0x194   : > { %1885 = vmatprep.mubr.msk.bf16.mxu1 %vm954_vm2, %v2927_v50  ;;  %1948 = vmatprep.mubr.msk.bf16.mxu0 %vm954_vm2, %v2927_v50 }
 0x195   : > { %1326 = vmatprep.subr.bf16.mxu1 %v2301_v23 }
 0x196   : > { %1327 = vmatpush1.bf16.msra.mxu1 %v2194_v1 }
 0x197   : > { %1328 = vmatprep.subr.bf16.mxu1 %v2301_v23 }
 0x19a   : > { %1329 = vmatpush1.bf16.msra.mxu1 %v2195_v59 }
 0x19b   : > { %v904_v5 = vpop.permute.xlu1 %903  ;;  %1330 = vmatprep.subr.bf16.mxu1 %v2301_v23 }
 0x19c   : > { %v2946_v9 = vsel %vm954_vm2, %v2710_v46, %v904_v5  ;;  %v2198_v46 = vld [vmem:[%s3283_s3 + $0x40] sm:$0xff]  }
 0x19d   : > { %1195 = vmatmul.mubr.bf16.gmra.mrb[8].mxu1 %v2946_v9  ;;  %1578 = vmatmul.mubr.bf16.gmra.mrb[64].mxu0 %v2946_v9 }
 0x19e   : > { %1886 = vmatprep.mubr.msk.bf16.mxu1 %vm954_vm2, %v2951_v30  ;;  %1949 = vmatprep.mubr.msk.bf16.mxu0 %vm954_vm2, %v2951_v30 }
 0x19f   : > { %1331 = vmatpush1.bf16.msra.mxu1 %v2196_v8 }
 0x1a0   : > { %1332 = vmatprep.subr.bf16.mxu1 %v2301_v23 }
 0x1a3   : > { %1333 = vmatpush1.bf16.msra.mxu1 %v2197_v10 }
 0x1a4   : > { %1334 = vmatprep.subr.bf16.mxu1 %v2301_v23 }
 0x1a7   : > { %1335 = vmatpush1.bf16.msra.mxu1 %v2198_v46 }
 0x1a8   : > { %1336 = vmatprep.subr.bf16.mxu1 %v2301_v23 }
 0x1a9   : > { %v906_v13 = vpop.permute.xlu1 %905 }
 0x1aa   : > { %v2973_v17 = vsel %vm954_vm2, %v2731_v12, %v906_v13  ;;  %v949_v12 = vrot.slane %v2797_v0, 1 }
 0x1ab   : > { %1203 = vmatmul.mubr.bf16.gmra.mrb[12].mxu1 %v2973_v17  ;;  %1586 = vmatmul.mubr.bf16.gmra.mrb[68].mxu0 %v2973_v17 }
 0x1ac   : > { %1887 = vmatprep.mubr.msk.bf16.mxu1 %vm954_vm2, %v2978_v7  ;;  %1950 = vmatprep.mubr.msk.bf16.mxu0 %vm954_vm2, %v2978_v7  ;;  %v3001_v0 = vsel %vm929_vm3, %v948_v22, %v949_v12 }
 0x1ad   : > { %1337 = vmatpush1.bf16.msra.mxu1 %v2199_v16 }
 0x1ae   : > { %1338 = vmatprep.subr.bf16.mxu1 %v2301_v23 }
 0x1b1   : > { %1339 = vmatpush1.bf16.msra.mxu1 %v2200_v37 }
 0x1b2   : > { %1340 = vmatprep.subr.bf16.mxu1 %v2301_v23 }
 0x1b3   : > { %v908_v44 = vpop.permute.xlu0 %907 }
 0x1b4   : > { %v2996_v3 = vsel %vm954_vm2, %v2764_v4, %v908_v44 }
 0x1b5   : > { %1211 = vmatmul.mubr.bf16.gmra.mrb[16].mxu1 %v2996_v3  ;;  %1594 = vmatmul.mubr.bf16.gmra.mrb[72].mxu0 %v2996_v3 }
 0x1b6   : > { %1888 = vmatprep.mubr.msk.bf16.mxu1 %vm954_vm2, %v3001_v0  ;;  %1951 = vmatprep.mubr.msk.bf16.mxu0 %vm954_vm2, %v3001_v0 }
 0x1b7   : > { %1341 = vmatpush1.bf16.msra.mxu1 %v2201_v38 }
 0x1b8   : > { %2046 = vmatprep.subr.bf16.mxu1 %v2301_v23 }
 0x1c1   : > { %v910_v4 = vpop.permute.xlu1 %909 }
 0x1c2   : > { %v974_v31 = vsel %vm954_vm2, %v2785_v41, %v910_v4  ;;  %v1021_v41 = vsel %vm929_vm3, %v1019_v51, %v1020_v42 }
 0x1c3   : > { %1219 = vmatmul.mubr.bf16.gmra.mrb[20].mxu1 %v974_v31  ;;  %1602 = vmatmul.mubr.bf16.gmra.mrb[76].mxu0 %v974_v31 }
 0x1c4   : > { %1889 = vmatprep.mubr.msk.bf16.mxu1 %vm954_vm2, %v953_v33  ;;  %1952 = vmatprep.mubr.msk.bf16.mxu0 %vm954_vm2, %v953_v33 }
 0x1cb   : > { %v912_v48 = vpop.permute.xlu0 %911 }
 0x1cc   : > { %v977_v45 = vsel %vm954_vm2, %v2826_v39, %v912_v48  ;;  %v932_v39 = vsel %vm929_vm3, %v930_v19, %v931_v35 }
 0x1cd   : > { %1227 = vmatmul.mubr.bf16.gmra.mrb[24].mxu1 %v977_v45  ;;  %1610 = vmatmul.mubr.bf16.gmra.mrb[80].mxu0 %v977_v45 }
 0x1ce   : > { %1890 = vmatprep.mubr.msk.bf16.mxu1 %vm954_vm2, %v1021_v41  ;;  %1953 = vmatprep.mubr.msk.bf16.mxu0 %vm954_vm2, %v1021_v41 }
 0x1cf   : > { %v898_v60 = vpop.permute.xlu0 %897 }
 0x1d0   : > { %v956_v55 = vsel %vm954_vm2, %v2579_v56, %v898_v60 }
 0x1d9   : > { %v1016_v54 = vpop.permute.xlu1 %1015 }
 0x1da   : > { %v1023_v58 = vsel %vm954_vm2, %v2850_v21, %v1016_v54 }
 0x1db   : > { %1235 = vmatmul.mubr.bf16.gmra.mrb[28].mxu1 %v1023_v58  ;;  %1618 = vmatmul.mubr.bf16.gmra.mrb[84].mxu0 %v1023_v58 }
 0x1dc   : > { %1903 = vmatprep.mubr.msk.bf16.mxu1 %vm954_vm2, %v932_v39 }
 0x1e3   : > { %1351 = vmatmul.mubr.bf16.vlgmr.msra.gmra.mrb[32].mxu1 %v956_v55 }
 0x1e4   : > { %2058 = vmatpush1.bf16.msra.mxu1 %v2486_v27  ;;  %1904 = vmatprep.mubr.msk.bf16.mxu1 %vm954_vm2, %v2665_v49  ;;  %v1432_v27 = vrot.slane %v2886_v24, 1 }
 0x1e5   : > { %2047 = vmatprep.subr.bf16.mxu1 %v2301_v23 }
 0x1e8   : > { %2059 = vmatpush1.bf16.msra.mxu1 %v2497_v29  ;;  %v1431_v29 = vrot.slane %v2884_v18, 1 }
 0x1e9   : > { %2048 = vmatprep.subr.bf16.mxu1 %v2301_v23 }
 0x1eb   : > { %1359 = vmatmul.mubr.bf16.gmra.mrb[36].mxu1 %v2898_v52 }
 0x1ec   : > { %1905 = vmatprep.mubr.msk.bf16.mxu1 %vm954_vm2, %v2696_v26  ;;  %2060 = vmatpush1.bf16.msra.mxu1 %v2509_v32  ;;  %v1433_v32 = vsel %vm929_vm3, %v1431_v29, %v1432_v27 }
 0x1ed   : > { %2049 = vmatprep.subr.bf16.mxu1 %v2301_v23 }
 0x1f0   : > { %2061 = vmatpush1.bf16.msra.mxu1 %v2522_v36  ;;  %v1428_v36 = vpop.permute.xlu1 %1427 }
 0x1f1   : > { %2050 = vmatprep.subr.bf16.mxu1 %v2301_v23 }
 0x1f3   : > { %1367 = vmatmul.mubr.bf16.gmra.mrb[40].mxu1 %v2919_v63 }
 0x1f4   : > { %1906 = vmatprep.mubr.msk.bf16.mxu1 %vm954_vm2, %v2927_v50  ;;  %2062 = vmatpush1.bf16.msra.mxu1 %v2542_v40  ;;  %v1435_v40 = vsel %vm954_vm2, %v2884_v18, %v1428_v36 }
 0x1f5   : > { %2051 = vmatprep.subr.bf16.mxu1 %v2301_v23 }
 0x1f8   : > { %2063 = vmatpush1.bf16.msra.mxu1 %v2558_v47 }
 0x1f9   : > { %2052 = vmatprep.subr.bf16.mxu1 %v2301_v23 }
 0x1fb   : > { %1375 = vmatmul.mubr.bf16.gmra.mrb[44].mxu1 %v2946_v9 }
 0x1fc   : > { %1907 = vmatprep.mubr.msk.bf16.mxu1 %vm954_vm2, %v2951_v30  ;;  %2064 = vmatpush1.bf16.msra.mxu1 %v2574_v53 }
 0x1fd   : > { %2053 = vmatprep.subr.bf16.mxu1 %v2301_v23 }
 0x200   : > { %2065 = vmatpush1.bf16.msra.mxu1 %v2592_v62 }
 0x201   : > { %2054 = vmatprep.subr.bf16.mxu1 %v2301_v23 }
 0x203   : > { %1383 = vmatmul.mubr.bf16.gmra.mrb[48].mxu1 %v2973_v17 }
 0x204   : > { %1908 = vmatprep.mubr.msk.bf16.mxu1 %vm954_vm2, %v2978_v7  ;;  %2066 = vmatpush1.bf16.msra.mxu1 %v2611_v6 }
 0x205   : > { %2055 = vmatprep.subr.bf16.mxu1 %v2301_v23 }
 0x208   : > { %2067 = vmatpush1.bf16.msra.mxu1 %v2631_v15 }
 0x209   : > { %2056 = vmatprep.subr.bf16.mxu1 %v2301_v23 }
 0x20b   : > { %1391 = vmatmul.mubr.bf16.gmra.mrb[52].mxu1 %v2996_v3 }
 0x20c   : > { %1909 = vmatprep.mubr.msk.bf16.mxu1 %vm954_vm2, %v3001_v0  ;;  %2068 = vmatpush1.bf16.msra.mxu1 %v2641_v20 }
 0x20d   : > { %2057 = vmatprep.subr.bf16.mxu1 %v2301_v23 }
 0x210   : > { %2069 = vmatpush1.bf16.msra.mxu1 %v2656_v43 }
 0x213   : > { %1399 = vmatmul.mubr.bf16.gmra.mrb[56].mxu1 %v974_v31 }
 0x214   : > { %1910 = vmatprep.mubr.msk.bf16.mxu1 %vm954_vm2, %v953_v33 }
 0x21b   : > { %1407 = vmatmul.mubr.bf16.gmra.mrb[60].mxu1 %v977_v45 }
 0x21c   : > { %1954 = vmatprep.mubr.msk.bf16.mxu1 %vm954_vm2, %v1433_v32 }
 0x223   : > { %1626 = vmatmul.mubr.bf16.vlgmr.msra.gmra.mrb[64].mxu1 %v1435_v40  ;;  %v3135_v40 = vld [vmem:[%s3284_s4] ss:$0 sm:$0xff] }
 0x258   : > { %v1180_v23 = vpop.f32.mrb[0].mxu1 }
 0x259   : > { %v1182_v47 = vpop.f32.mrb[1].mxu1 }
 0x25a   : > { %v3077_v53 = vpop.f32.mrb[2].mxu1 }
 0x25b   : > { %v1185_v56 = vpop.f32.mrb[3].mxu1 }
 0x266   : > { %v3079_v62 = vpop.f32.mrb[4].mxu1  ;;  %v1571_v6 = vpop.f32.mrb[60].mxu0 }
 0x267   : > { %v1190_v15 = vpop.f32.mrb[5].mxu1  ;;  %v1573_v20 = vpop.f32.mrb[61].mxu0 }
 0x268   : > { %v3081_v43 = vpop.f32.mrb[6].mxu1  ;;  %v1574_v49 = vpop.f32.mrb[62].mxu0 }
 0x269   : > { %v1193_v26 = vpop.f32.mrb[7].mxu1  ;;  %v1576_v34 = vpop.f32.mrb[63].mxu0 }
 0x270   : > { %v3083_v21 = vpop.f32.mrb[8].mxu1  ;;  %v3085_v24 = vpop.f32.mrb[64].mxu0 }
 0x271   : > { %v1198_v18 = vpop.f32.mrb[9].mxu1  ;;  %v1581_v52 = vpop.f32.mrb[65].mxu0 }
 0x272   : > { %v3087_v61 = vpop.f32.mrb[10].mxu1  ;;  %v3089_v63 = vpop.f32.mrb[66].mxu0 }
 0x273   : > { %v1201_v1 = vpop.f32.mrb[11].mxu1  ;;  %v1584_v50 = vpop.f32.mrb[67].mxu0 }
 0x27e   : > { %v3091_v59 = vpop.f32.mrb[12].mxu1  ;;  %v3093_v2 = vpop.f32.mrb[68].mxu0 }
 0x27f   : > { %v1206_v5 = vpop.f32.mrb[13].mxu1  ;;  %v1589_v57 = vpop.f32.mrb[69].mxu0 }
 0x280   : > { %v3095_v8 = vpop.f32.mrb[14].mxu1  ;;  %v3097_v9 = vpop.f32.mrb[70].mxu0 }
 0x281   : > { %v1209_v30 = vpop.f32.mrb[15].mxu1  ;;  %v1592_v10 = vpop.f32.mrb[71].mxu0 }
 0x288   : > { %v3099_v46 = vpop.f32.mrb[16].mxu1  ;;  %v3101_v11 = vpop.f32.mrb[72].mxu0 }
 0x289   : > { %v1214_v13 = vpop.f32.mrb[17].mxu1  ;;  %v1597_v14 = vpop.f32.mrb[73].mxu0 }
 0x28a   : > { %v3103_v16 = vpop.f32.mrb[18].mxu1  ;;  %v3105_v17 = vpop.f32.mrb[74].mxu0 }
 0x28b   : > { %v1217_v7 = vpop.f32.mrb[19].mxu1  ;;  %v1600_v37 = vpop.f32.mrb[75].mxu0 }
 0x296   : > { %v3107_v12 = vpop.f32.mrb[20].mxu1  ;;  %v3109_v44 = vpop.f32.mrb[76].mxu0 }
 0x297   : > { %v1222_v22 = vpop.f32.mrb[21].mxu1  ;;  %v1605_v38 = vpop.f32.mrb[77].mxu0 }
 0x298   : > { %v3111_v3 = vpop.f32.mrb[22].mxu1  ;;  %v3113_v0 = vpop.f32.mrb[78].mxu0 }
 0x299   : > { %v1225_v25 = vpop.f32.mrb[23].mxu1  ;;  %v1608_v4 = vpop.f32.mrb[79].mxu0 }
 0x2a0   : > { %v3115_v28 = vpop.f32.mrb[24].mxu1  ;;  %v3117_v31 = vpop.f32.mrb[80].mxu0 }
 0x2a1   : > { %v1230_v33 = vpop.f32.mrb[25].mxu1  ;;  %v1613_v42 = vpop.f32.mrb[81].mxu0 }
 0x2a2   : > { %v3119_v48 = vpop.f32.mrb[26].mxu1  ;;  %v3121_v51 = vpop.f32.mrb[82].mxu0 }
 0x2a3   : > { %v1233_v45 = vpop.f32.mrb[27].mxu1  ;;  %v1616_v41 = vpop.f32.mrb[83].mxu0 }
 0x2ae   : > { %v3123_v35 = vpop.f32.mrb[28].mxu1  ;;  %v3125_v54 = vpop.f32.mrb[84].mxu0 }
 0x2af   : > { %v1238_v19 = vpop.f32.mrb[29].mxu1  ;;  %v1621_v58 = vpop.f32.mrb[85].mxu0 }
 0x2b0   : > { %v3127_v39 = vpop.f32.mrb[30].mxu1  ;;  %v3129_v60 = vpop.f32.mrb[86].mxu0 }
 0x2b1   : > { %v1241_v55 = vpop.f32.mrb[31].mxu1  ;;  %v1624_v27 = vpop.f32.mrb[87].mxu0 }
 0x2b6   : > { %v1352_v29 = vpop.f32.mrb[32].mxu1 }
 0x2b7   : > { %v1353_v32 = vadd.f32 %v1352_v29, %v1180_v23  ;;  %v1354_v36 = vpop.f32.mrb[33].mxu1 }
 0x2b8   : > { %v1355_v47 = vpop.f32.mrb[34].mxu1 }
 0x2b9   : > { %v1634_v56 = vadd.f32 %v1571_v6, %v1353_v32  ;;  %v1356_v15 = vadd.f32 %v1355_v47, %v3077_v53  ;;  %v1357_v20 = vpop.f32.mrb[35].mxu1 }
 0x2bb   : > { %v1657_v26 = vadd.f32 %v3135_v40, %v1634_v56  ;;  %v1635_v34 = vadd.f32 %v1574_v49, %v1356_v15 }
 0x2bd   : > { %v1673_v18 = vmax.f32 %v1657_v26, 0.0  ;;  %v1658_v52 = vadd.f32 %v3135_v40, %v1635_v34 }
 0x2be   : > { %v1360_v23 = vpop.f32.mrb[36].mxu1 }
 0x2bf   : > { %1689 = vst.msk [vmem:[%s3142_s30] sm:$0xff] %vm954_vm2, %v1673_v18  ;;  %v1674_v1 = vmax.f32 %v1658_v52, 0.0  ;;  %v1361_v6 = vadd.f32 %v1360_v23, %v3079_v62  ;;  %v1362_v50 = vpop.f32.mrb[37].mxu1 }
 0x2c0   : > { %v1363_v53 = vpop.f32.mrb[38].mxu1 }
 0x2c1   : > { %1690 = vst.msk [vmem:[%s3142_s30 + $0x8] sm:$0xff] %vm954_vm2, %v1674_v1  ;;  %v1636_v49 = vadd.f32 %v3085_v24, %v1361_v6  ;;  %v1364_v5 = vadd.f32 %v1363_v53, %v3081_v43  ;;  %v1365_v57 = vpop.f32.mrb[39].mxu1 }
 0x2c3   : > { %v1659_v30 = vadd.f32 %v3135_v40, %v1636_v49  ;;  %v1637_v10 = vadd.f32 %v3089_v63, %v1364_v5 }
 0x2c5   : > { %v1675_v13 = vmax.f32 %v1659_v30, 0.0  ;;  %v1660_v14 = vadd.f32 %v3135_v40, %v1637_v10 }
 0x2c6   : > { %v1368_v7 = vpop.f32.mrb[40].mxu1 }
 0x2c7   : > { %1691 = vst.msk [vmem:[%s3142_s30 + $0x10] sm:$0xff] %vm954_vm2, %v1675_v13  ;;  %v1676_v62 = vmax.f32 %v1660_v14, 0.0  ;;  %v1369_v37 = vadd.f32 %v1368_v7, %v3083_v21  ;;  %v1370_v22 = vpop.f32.mrb[41].mxu1 }
 0x2c8   : > { %v1371_v24 = vpop.f32.mrb[42].mxu1 }
 0x2c9   : > { %1692 = vst.msk [vmem:[%s3142_s30 + $0x18] sm:$0xff] %vm954_vm2, %v1676_v62  ;;  %v1638_v43 = vadd.f32 %v3093_v2, %v1369_v37  ;;  %v1372_v38 = vadd.f32 %v1371_v24, %v3087_v61  ;;  %v1373_v63 = vpop.f32.mrb[43].mxu1 }
 0x2cb   : > { %v1661_v25 = vadd.f32 %v3135_v40, %v1638_v43  ;;  %v1639_v4 = vadd.f32 %v3097_v9, %v1372_v38 }
 0x2cd   : > { %v1677_v33 = vmax.f32 %v1661_v25, 0.0  ;;  %v1662_v42 = vadd.f32 %v3135_v40, %v1639_v4 }
 0x2ce   : > { %v1376_v45 = vpop.f32.mrb[44].mxu1 }
 0x2cf   : > { %1693 = vst.msk [vmem:[%s3142_s30 + $0x20] sm:$0xff] %vm954_vm2, %v1677_v33  ;;  %v1678_v21 = vmax.f32 %v1662_v42, 0.0  ;;  %v1377_v41 = vadd.f32 %v1376_v45, %v3091_v59  ;;  %v1378_v19 = vpop.f32.mrb[45].mxu1 }
 0x2d0   : > { %v1379_v2 = vpop.f32.mrb[46].mxu1 }
 0x2d1   : > { %1694 = vst.msk [vmem:[%s3142_s30 + $0x28] sm:$0xff] %vm954_vm2, %v1678_v21  ;;  %v1640_v61 = vadd.f32 %v3101_v11, %v1377_v41  ;;  %v1380_v58 = vadd.f32 %v1379_v2, %v3095_v8  ;;  %v1381_v9 = vpop.f32.mrb[47].mxu1 }
 0x2d3   : > { %v1663_v55 = vadd.f32 %v3135_v40, %v1640_v61  ;;  %v1641_v27 = vadd.f32 %v3105_v17, %v1380_v58 }
 0x2d5   : > { %v1679_v29 = vmax.f32 %v1663_v55, 0.0  ;;  %v1664_v32 = vadd.f32 %v3135_v40, %v1641_v27 }
 0x2d6   : > { %v1384_v36 = vpop.f32.mrb[48].mxu1 }
 0x2d7   : > { %1695 = vst.msk [vmem:[%s3142_s30 + $0x30] sm:$0xff] %vm954_vm2, %v1679_v29  ;;  %v1680_v59 = vmax.f32 %v1664_v32, 0.0  ;;  %v1385_v47 = vadd.f32 %v1384_v36, %v3099_v46  ;;  %v1386_v56 = vpop.f32.mrb[49].mxu1 }
 0x2d8   : > { %v1387_v11 = vpop.f32.mrb[50].mxu1 }
 0x2d9   : > { %1696 = vst.msk [vmem:[%s3142_s30 + $0x38] sm:$0xff] %vm954_vm2, %v1680_v59  ;;  %v1642_v8 = vadd.f32 %v3109_v44, %v1385_v47  ;;  %v1388_v15 = vadd.f32 %v1387_v11, %v3103_v16  ;;  %v1389_v17 = vpop.f32.mrb[51].mxu1 }
 0x2db   : > { %v1665_v20 = vadd.f32 %v3135_v40, %v1642_v8  ;;  %v1643_v26 = vadd.f32 %v3113_v0, %v1388_v15 }
 0x2dd   : > { %v1681_v34 = vmax.f32 %v1665_v20, 0.0  ;;  %v1666_v18 = vadd.f32 %v3135_v40, %v1643_v26 }
 0x2de   : > { %v1392_v52 = vpop.f32.mrb[52].mxu1 }
 0x2df   : > { %1697 = vst.msk [vmem:[%s3142_s30 + $0x40] sm:$0xff] %vm954_vm2, %v1681_v34  ;;  %v1682_v46 = vmax.f32 %v1666_v18, 0.0  ;;  %v1393_v23 = vadd.f32 %v1392_v52, %v3107_v12  ;;  %v1394_v1 = vpop.f32.mrb[53].mxu1 }
 0x2e0   : > { %v1395_v44 = vpop.f32.mrb[54].mxu1 }
 0x2e1   : > { %1698 = vst.msk [vmem:[%s3142_s30 + $0x48] sm:$0xff] %vm954_vm2, %v1682_v46  ;;  %v1644_v16 = vadd.f32 %v3117_v31, %v1393_v23  ;;  %v1396_v6 = vadd.f32 %v1395_v44, %v3111_v3  ;;  %v1397_v0 = vpop.f32.mrb[55].mxu1 }
 0x2e3   : > { %v1667_v50 = vadd.f32 %v3135_v40, %v1644_v16  ;;  %v1645_v53 = vadd.f32 %v3121_v51, %v1396_v6 }
 0x2e5   : > { %v1683_v49 = vmax.f32 %v1667_v50, 0.0  ;;  %v1668_v5 = vadd.f32 %v3135_v40, %v1645_v53 }
 0x2e6   : > { %v1400_v57 = vpop.f32.mrb[56].mxu1 }
 0x2e7   : > { %1699 = vst.msk [vmem:[%s3142_s30 + $0x50] sm:$0xff] %vm954_vm2, %v1683_v49  ;;  %v1684_v12 = vmax.f32 %v1668_v5, 0.0  ;;  %v1401_v30 = vadd.f32 %v1400_v57, %v3115_v28  ;;  %v1402_v10 = vpop.f32.mrb[57].mxu1 }
 0x2e8   : > { %v1403_v31 = vpop.f32.mrb[58].mxu1 }
 0x2e9   : > { %1700 = vst.msk [vmem:[%s3142_s30 + $0x58] sm:$0xff] %vm954_vm2, %v1684_v12  ;;  %v1646_v3 = vadd.f32 %v3125_v54, %v1401_v30  ;;  %v1404_v51 = vadd.f32 %v1403_v31, %v3119_v48  ;;  %v1405_v13 = vpop.f32.mrb[59].mxu1 }
 0x2eb   : > { %v1669_v14 = vadd.f32 %v3135_v40, %v1646_v3  ;;  %v1647_v7 = vadd.f32 %v3129_v60, %v1404_v51 }
 0x2ed   : > { %v1685_v62 = vmax.f32 %v1669_v14, 0.0  ;;  %v1670_v37 = vadd.f32 %v3135_v40, %v1647_v7 }
 0x2ee   : > { %v1408_v28 = vpop.f32.mrb[60].mxu1 }
 0x2ef   : > { %1701 = vst.msk [vmem:[%s3142_s30 + $0x60] sm:$0xff] %vm954_vm2, %v1685_v62  ;;  %v1686_v22 = vmax.f32 %v1670_v37, 0.0  ;;  %v1409_v24 = vadd.f32 %v1408_v28, %v3123_v35  ;;  %v1410_v43 = vpop.f32.mrb[61].mxu1 }
 0x2f0   : > { %v1411_v54 = vpop.f32.mrb[62].mxu1 }
 0x2f1   : > { %1702 = vst.msk [vmem:[%s3142_s30 + $0x68] sm:$0xff] %vm954_vm2, %v1686_v22  ;;  %v1412_v48 = vadd.f32 %v1411_v54, %v3127_v39  ;;  %v1413_v38 = vpop.f32.mrb[63].mxu1 }
 0x2f6   : > { %v1627_v60 = vpop.f32.mrb[64].mxu1 }
 0x2f7   : > { %v1648_v63 = vadd.f32 %v1627_v60, %v1409_v24  ;;  %v1629_v25 = vpop.f32.mrb[65].mxu1 }
 0x2f8   : > { %v1630_v4 = vpop.f32.mrb[66].mxu1 }
 0x2f9   : > { %v1671_v35 = vadd.f32 %v3135_v40, %v1648_v63  ;;  %v1649_v33 = vadd.f32 %v1630_v4, %v1412_v48  ;;  %v1632_v42 = vpop.f32.mrb[67].mxu1 }
 0x2fb   : > { %v1687_v45 = vmax.f32 %v1671_v35, 0.0  ;;  %v1672_v39 = vadd.f32 %v3135_v40, %v1649_v33 }
 0x2fd   : > { %1703 = vst.msk [vmem:[%s3142_s30 + $0x70] sm:$0xff] %vm954_vm2, %v1687_v45  ;;  %v1688_v21 = vmax.f32 %v1672_v39, 0.0 }
 0x2ff   : > { %1704 = vst.msk [vmem:[%s3142_s30 + $0x78] sm:$0xff] %vm954_vm2, %v1688_v21 }
 0x300   : > { %2215 = shalt.err (!%p2212_p6)
}
 0x301   : > { %s2216_s16 = scalar_lea.hbm %s3218_s22, 2048  ;;  %s2220_s10 = scalar_lea.hbm %s3285_s5, 8192 }
 0x302   : > { %p2217_p7 = scmp.ne.s32.totalorder %s3218_s22, %s2216_s16  ;;  %p2221_p11 = scmp.lt.u32.totalorder %s3218_s22, %s3285_s5 }
 0x303   : > { %p2222_p12 = scmp.lt.u32.totalorder %s2220_s10, %s2216_s16  ;;  %p2224_p0 = scmp.lt.u32.totalorder %s2216_s16, %s3218_s22 }
 0x304   : > { %p2218_p9 = pnand %p2217_p7, %p2387_p3 }
 0x305   : > { %p2223_p13 = por %p2222_p12, %p2221_p11 }
 0x306   : > { %p2219_p10 = pneg %p2218_p9 }
 0x307   : > { %p2225_p1 = por %p2224_p0, %p2223_p13 }
 0x309   : > { %p2226_p2 = pnand %p2225_p1, %p2219_p10 }
 0x30b   : > { %2229 = shalt.err (!%p2226_p2)
}
 0x30c   : > { %s2304_s14 = smov 128   ;;  %s2305_s17 = smov 8  }
 0x30d   : > { %2071 = dma.vmem_to_hbm [thread:$0]  (%p2387_p3), %s3220_s13, 2048, %s3218_s22, %s3228_s15, %s2304_s14, %s2304_s14, %s2305_s17  }
 0x30e PF: > { %p2077_p4 = scmp.ge.s32.totalorder %s2296_s25, 2  ;;  %s1737_s26 = sand.u32 1, %s2268_s18  }
 0x30f   : > { %s1738_s27 = scalar_lea.sflag [#allocation3], %s1737_s26 }
 0x310   : > { %p2074_p5 = pnand %p2077_p4, %p2396_p8 }
 0x312   : > { %2263 = dma.done.wait (!%p2074_p5), %s1738_s27, 2048  }
 0x313   : > { %2265 = vsyncadd (!%p2074_p5), %s1738_s27, 4294965248  ;;  %s18_s25 = sadd.s32 1, %s2296_s25   ;;  %s3308_s18 = smov %s2272_s19 }
 0x314   : > { %p15_p6 = scmp.ge.s32.totalorder %s18_s25, 6   ;;  %s3309_s19 = smov %s2276_s20 }
 0x315   : > { %s3310_s20 = smov %s2405_s11  ;;  %s3311_s21 = smov %s2288_s23 }
 0x316   : > { %s3312_s22 = smov %s2292_s24  ;;  %s3313_s23 = smov %s3316_s28 }
 0x317   : > { %s3314_s24 = smov %s3320_s29  ;;  %17 = sbr.rel (!%p15_p6) target bundleno = 5 (0x5), region = 78 }
 0x31e   :  { %1743 = vsyncpa [#allocation3], 1 }
 0x31f   :  { %1745 = vsyncpa [#allocation3 + $0x1], 1 }

</bundles_post_ra>
